<compile_context>
chip_gen: v7x
topology: tpu7x:2x2x1
jax: 0.10.0
libtpu: 0.0.40
codegen_flags: <defaults>
</compile_context>

<pallas_src>
import functools

import jax
import jax.numpy as jnp
from jax.experimental import pallas as pl
from jax.experimental.pallas import tpu as pltpu


def _round_up(x, m):
    return (x + m - 1) // m * m


def _pad2(a, r, c):
    return jnp.pad(a, ((0, r - a.shape[0]), (0, c - a.shape[1])))


# ---------------------------------------------------------------------------
# Kernel
# ---------------------------------------------------------------------------
def _compose_bilinear_kernel(x1_ref, x2_ref, wl_ref, wr_ref, wo_ref, ll_ref,
                             lr_ref, b_ref, o_ref, *, activation,
                             compute_dtype):
    """One batch tile: 5 MXU dots, f32 accumulation, no in-kernel copies."""
    # Cast in-kernel (the f32 blocks are DMA'd directly; no wrapper-side
    # cast => no extra HBM pass before the kernel).
    x1 = x1_ref[...].astype(compute_dtype)
    x2 = x2_ref[...].astype(compute_dtype)

    # Rank-1 pooled bilinear projections.
    y_l = jnp.dot(x1, wl_ref[...], preferred_element_type=jnp.float32)  # (tb, K)
    y_r = jnp.dot(x2, wr_ref[...], preferred_element_type=jnp.float32)  # (tb, K)

    p = (y_l * y_r).astype(compute_dtype)                               # (tb, K)

    # y = p @ W_o + x1 @ L_l + x2 @ L_r + bias   (three accumulating dots;
    # MXU accumulation is free, unlike the previous lane-axis concatenate).
    y = jnp.dot(p, wo_ref[...], preferred_element_type=jnp.float32)     # (tb, S)
    y = y + jnp.dot(x1, ll_ref[...], preferred_element_type=jnp.float32)
    y = y + jnp.dot(x2, lr_ref[...], preferred_element_type=jnp.float32)
    y = y + b_ref[...]                                                  # f32 bias

    if activation is not None:
        # Must be elementwise (DIORA's are); padded lanes are sliced off
        # outside the kernel, so feature-axis reductions would be wrong here.
        y = activation(y)

    o_ref[...] = y.astype(o_ref.dtype)


# ---------------------------------------------------------------------------
# One-time parameter preparation (NOT per compose call)
# ---------------------------------------------------------------------------
def prepare_params(params, compute_dtype=jnp.bfloat16):
    """Transpose / pad / cast the DecomposedBilinear parameters once."""
    S = params["L_l"].shape[0]
    K = params["W_l"].shape[0]
    s_pad = _round_up(S, 128)
    k_pad = _round_up(K, 128)

    # TODO(synk): optional fp8 weight quantization (per-tensor scales) for
    # v7x small-batch serving; not applicable to v5e/v6e (int MXU, no fp8).
    return {
        "wl": _pad2(params["W_l"][:, :, 0].T, s_pad, k_pad).astype(compute_dtype),
        "wr": _pad2(params["W_r"][:, :, 0].T, s_pad, k_pad).astype(compute_dtype),
        "wo": _pad2(params["W_o"][:, 0, :], k_pad, s_pad).astype(compute_dtype),
        "ll": _pad2(params["L_l"], s_pad, s_pad).astype(compute_dtype),
        "lr": _pad2(params["L_r"], s_pad, s_pad).astype(compute_dtype),
        "bias": jnp.pad(params["bias"], (0, s_pad - S))
                   .reshape(1, s_pad).astype(jnp.float32),
        "size": S,
        "size_pad": s_pad,
        "pool_pad": k_pad,
        "compute_dtype": compute_dtype,
    }


# ---------------------------------------------------------------------------
# Wrapper
# ---------------------------------------------------------------------------
def _choose_tb(b_rows):
    """Batch tile: one grid step for small batches (launch latency dominates),
    512-row tiles (>=2 'parallel' steps, v7x-megacore shardable) for big ones.
    512x512 f32 double-buffered tiles stay well under v7x's scoped-VMEM
    default, so no vmem_limit override is needed."""
    return b_rows if b_rows <= 512 else 512


# Flipped to False at runtime if this JAX build rejects pl.Buffered(1).
_WEIGHT_SINGLE_BUFFER = [True]


def _const_spec(shape, single_buffer):
    # Constant index map: the block never changes across the batch grid, so
    # the weight is DMA'd HBM->VMEM once per call and stays resident.
    if single_buffer:
        # Single-buffer a never-changing block: halves its VMEM footprint.
        return pl.BlockSpec(shape, lambda i: (0, 0),
                            pipeline_mode=pl.Buffered(1))
    return pl.BlockSpec(shape, lambda i: (0, 0))


def compose_bilinear(x1, x2, prep, *, activation=None, tb=None,
                     out_dtype=None):
    """Pallas forward pass.

    x1, x2     : (B, S) arrays (any B; f32 in DIORA). Cast to the compute
                 dtype inside the kernel.
    prep       : output of prepare_params().
    activation : optional ELEMENTWISE activation applied in-kernel.
    out_dtype  : output dtype (default: x1.dtype). Pass jnp.bfloat16 if the
                 downstream chart accepts it to cut HBM write traffic.

    NOTE: amortize launch + weight-DMA overhead by batching an entire DIORA
    chart level (all cells, both child orderings) into one call.
    """
    B, S = x1.shape
    assert S == prep["size"]
    s_pad = prep["size_pad"]
    cdt = prep["compute_dtype"]
    out_dtype = x1.dtype if out_dtype is None else out_dtype

    # Pad only when actually needed (feature axis not a lane multiple, or
    # batch not a sublane multiple); otherwise DMA the originals directly.
    b_rows = _round_up(B, 8)
    if b_rows != B or s_pad != S:
        x1 = jnp.pad(x1, ((0, b_rows - B), (0, s_pad - S)))
        x2 = jnp.pad(x2, ((0, b_rows - B), (0, s_pad - S)))

    tb = _choose_tb(b_rows) if tb is None else tb
    grid = (pl.cdiv(b_rows, tb),)   # ragged last tile handled by Pallas

    kernel = functools.partial(_compose_bilinear_kernel,
                               activation=activation, compute_dtype=cdt)

    batch_spec = pl.BlockSpec((tb, s_pad), lambda i: (i, 0))

    def call(single_buffer):
        return pl.pallas_call(
            kernel,
            out_shape=jax.ShapeDtypeStruct((b_rows, s_pad), out_dtype),
            grid_spec=pltpu.PrefetchScalarGridSpec(
                num_scalar_prefetch=0,
                grid=grid,
                in_specs=[
                    batch_spec,                                     # x1
                    batch_spec,                                     # x2
                    _const_spec(prep["wl"].shape, single_buffer),   # W_l^T
                    _const_spec(prep["wr"].shape, single_buffer),   # W_r^T
                    _const_spec(prep["wo"].shape, single_buffer),   # W_o
                    _const_spec(prep["ll"].shape, single_buffer),   # L_l
                    _const_spec(prep["lr"].shape, single_buffer),   # L_r
                    _const_spec(prep["bias"].shape, single_buffer), # bias
                ],
                out_specs=batch_spec,
            ),
            compiler_params=pltpu.CompilerParams(
                dimension_semantics=("parallel",)),
        )(x1, x2, prep["wl"], prep["wr"], prep["wo"], prep["ll"], prep["lr"],
          prep["bias"])

    if _WEIGHT_SINGLE_BUFFER[0]:
        try:
            out = call(True)
        except Exception:  # Buffered(1) unsupported on this build: fall back.
            _WEIGHT_SINGLE_BUFFER[0] = False
            out = call(False)
    else:
        out = call(False)

    if out.shape != (B, S):
        out = out[:B, :S]
    return out


# ---------------------------------------------------------------------------
# Reference + synthetic init (for testing)
# ---------------------------------------------------------------------------
def init_params(key, size):
    """Deterministic synthetic parameter init (matches module shapes)."""
    ks = jax.random.split(key, 6)
    scale = 1.0 / jnp.sqrt(size)
    return {
        "W_l": jax.random.normal(ks[0], (size, size, 1), jnp.float32) * scale,
        "W_r": jax.random.normal(ks[1], (size, size, 1), jnp.float32) * scale,
        "W_o": jax.random.normal(ks[2], (size, 1, size), jnp.float32) * scale,
        "L_l": jax.random.normal(ks[3], (size, size), jnp.float32) * scale,
        "L_r": jax.random.normal(ks[4], (size, size), jnp.float32) * scale,
        "bias": jax.random.normal(ks[5], (size,), jnp.float32) * scale,
    }


def compose_bilinear_ref(x1, x2, params, activation=None, cast=None):
    """Pure-JAX reference of the PyTorch forward pass."""
    c = (lambda a: a.astype(cast)) if cast is not None else (lambda a: a)
    f32 = jnp.float32
    y_l = jnp.einsum("bi,kid->bkd", c(x1), c(params["W_l"]),
                     preferred_element_type=f32)
    y_r = jnp.einsum("bj,kjd->bkd", c(x2), c(params["W_r"]),
                     preferred_element_type=f32)
    p = y_l * y_r
    if cast is not None:
        p = p.astype(cast)
    y = jnp.einsum("bkd,kdo->bo", p, c(params["W_o"]),
                   preferred_element_type=f32)
    y = y + jnp.dot(c(x1), c(params["L_l"]), preferred_element_type=f32)
    y = y + jnp.dot(c(x2), c(params["L_r"]), preferred_element_type=f32)
    y = y + params["bias"][None, :].astype(f32)
    if activation is not None:
        y = activation(y)
    return y


if __name__ == "__main__":
    key = jax.random.PRNGKey(0)
    k_x1, k_x2, k_p = jax.random.split(key, 3)

    B, S = 16, 128  # batch of span vectors, DIORA hidden size
    x1 = jax.random.normal(k_x1, (B, S), jnp.float32)
    x2 = jax.random.normal(k_x2, (B, S), jnp.float32)
    params = init_params(k_p, S)

    # --- f32 operand path: tight semantics check against the reference. ---
    prep_f32 = prepare_params(params, compute_dtype=jnp.float32)
    out_f32 = jax.block_until_ready(compose_bilinear(x1, x2, prep_f32))
    ref_f32 = compose_bilinear_ref(x1, x2, params)
    assert out_f32.shape == (B, S) and out_f32.dtype == jnp.float32
    assert jnp.allclose(out_f32, ref_f32, atol=5e-4, rtol=5e-4)

    # --- bf16 operand / f32 accumulation path (perf config on v6e/v7x). ---
    prep_bf16 = prepare_params(params, compute_dtype=jnp.bfloat16)
    out_bf16 = jax.block_until_ready(compose_bilinear(x1, x2, prep_bf16))
    ref_bf16 = compose_bilinear_ref(x1, x2, params, cast=jnp.bfloat16)
    assert out_bf16.shape == (B, S) and out_bf16.dtype == jnp.float32
    assert jnp.allclose(out_bf16, ref_bf16, atol=2e-2, rtol=2e-2)
    assert jnp.allclose(out_bf16, ref_f32, atol=1e-1, rtol=1e-1)

    # --- elementwise activation, as the module allows. ---
    out_act = jax.block_until_ready(
        compose_bilinear(x1, x2, prep_f32, activation=jax.nn.relu))
    ref_act = compose_bilinear_ref(x1, x2, params, activation=jax.nn.relu)
    assert jnp.allclose(out_act, ref_act, atol=5e-4, rtol=5e-4)

    # --- ragged batch (exercises the pad-only-when-needed path). ---
    x1r, x2r = x1[:13], x2[:13]
    out_r = jax.block_until_ready(compose_bilinear(x1r, x2r, prep_f32))
    assert out_r.shape == (13, S)
    assert jnp.allclose(out_r, ref_f32[:13], atol=5e-4, rtol=5e-4)

    # --- large batch: multi-tile 'parallel' grid with a ragged last tile. ---
    Bw = 1040  # -> tb=512, grid=3 (512+512+16 rows)
    kx1, kx2 = jax.random.split(jax.random.PRNGKey(1))
    x1w = jax.random.normal(kx1, (Bw, S), jnp.float32)
    x2w = jax.random.normal(kx2, (Bw, S), jnp.float32)
    out_w = jax.block_until_ready(compose_bilinear(x1w, x2w, prep_f32))
    ref_w = compose_bilinear_ref(x1w, x2w, params)
    assert out_w.shape == (Bw, S)
    assert jnp.allclose(out_w, ref_w, atol=5e-4, rtol=5e-4)

    print("KERNEL_OK")
</pallas_src>

<mosaic_0001>
module attributes {stable_mosaic.version = 11 : i64} {
  func.func @_compose_bilinear_kernel(%arg0: i32, %arg1: memref<16x128xf32, #tpu.memory_space<vmem>>, %arg2: memref<16x128xf32, #tpu.memory_space<vmem>>, %arg3: memref<128x128xf32, #tpu.memory_space<vmem>>, %arg4: memref<128x128xf32, #tpu.memory_space<vmem>>, %arg5: memref<128x128xf32, #tpu.memory_space<vmem>>, %arg6: memref<128x128xf32, #tpu.memory_space<vmem>>, %arg7: memref<128x128xf32, #tpu.memory_space<vmem>>, %arg8: memref<1x128xf32, #tpu.memory_space<vmem>>, %arg9: memref<16x128xf32, #tpu.memory_space<vmem>>) attributes {dimension_semantics = [#tpu.dimension_semantics<parallel>], iteration_bounds = array<i64: 1>, scalar_prefetch = 0 : i64, scratch_operands = 0 : i64, tpu.core_type = #tpu.core_type<tc>, window_params = [{transform_indices = @transform_0, window_bounds = array<i64: 16, 128>}, {transform_indices = @transform_1, window_bounds = array<i64: 16, 128>}, {pipeline_mode = #tpu.pipeline_mode<synchronous>, transform_indices = @transform_2, window_bounds = array<i64: 128, 128>}, {pipeline_mode = #tpu.pipeline_mode<synchronous>, transform_indices = @transform_3, window_bounds = array<i64: 128, 128>}, {pipeline_mode = #tpu.pipeline_mode<synchronous>, transform_indices = @transform_4, window_bounds = array<i64: 128, 128>}, {pipeline_mode = #tpu.pipeline_mode<synchronous>, transform_indices = @transform_5, window_bounds = array<i64: 128, 128>}, {pipeline_mode = #tpu.pipeline_mode<synchronous>, transform_indices = @transform_6, window_bounds = array<i64: 128, 128>}, {pipeline_mode = #tpu.pipeline_mode<synchronous>, transform_indices = @transform_7, window_bounds = array<i64: 1, 128>}, {transform_indices = @transform_8, window_bounds = array<i64: 16, 128>}]} {
    %c0 = arith.constant 0 : index
    %c0_0 = arith.constant 0 : index
    %0 = vector.load %arg1[%c0, %c0_0] : memref<16x128xf32, #tpu.memory_space<vmem>>, vector<16x128xf32>
    %c0_1 = arith.constant 0 : index
    %c0_2 = arith.constant 0 : index
    %1 = vector.load %arg2[%c0_1, %c0_2] : memref<16x128xf32, #tpu.memory_space<vmem>>, vector<16x128xf32>
    %c0_3 = arith.constant 0 : index
    %c0_4 = arith.constant 0 : index
    %2 = vector.load %arg3[%c0_3, %c0_4] : memref<128x128xf32, #tpu.memory_space<vmem>>, vector<128x128xf32>
    %cst = arith.constant dense<0.000000e+00> : vector<16x128xf32>
    %3 = tpu.matmul %0, %2, %cst {dimension_numbers = #tpu.dot_dimension_numbers<[1], [0], [0], [1], [0, 0, 1, 1], [], []>} : vector<16x128xf32>, vector<128x128xf32>, vector<16x128xf32> -> vector<16x128xf32>
    %c0_5 = arith.constant 0 : index
    %c0_6 = arith.constant 0 : index
    %4 = vector.load %arg4[%c0_5, %c0_6] : memref<128x128xf32, #tpu.memory_space<vmem>>, vector<128x128xf32>
    %cst_7 = arith.constant dense<0.000000e+00> : vector<16x128xf32>
    %5 = tpu.matmul %1, %4, %cst_7 {dimension_numbers = #tpu.dot_dimension_numbers<[1], [0], [0], [1], [0, 0, 1, 1], [], []>} : vector<16x128xf32>, vector<128x128xf32>, vector<16x128xf32> -> vector<16x128xf32>
    %6 = arith.mulf %3, %5 : vector<16x128xf32>
    %c0_8 = arith.constant 0 : index
    %c0_9 = arith.constant 0 : index
    %7 = vector.load %arg5[%c0_8, %c0_9] : memref<128x128xf32, #tpu.memory_space<vmem>>, vector<128x128xf32>
    %cst_10 = arith.constant dense<0.000000e+00> : vector<16x128xf32>
    %8 = tpu.matmul %6, %7, %cst_10 {dimension_numbers = #tpu.dot_dimension_numbers<[1], [0], [0], [1], [0, 0, 1, 1], [], []>} : vector<16x128xf32>, vector<128x128xf32>, vector<16x128xf32> -> vector<16x128xf32>
    %c0_11 = arith.constant 0 : index
    %c0_12 = arith.constant 0 : index
    %9 = vector.load %arg6[%c0_11, %c0_12] : memref<128x128xf32, #tpu.memory_space<vmem>>, vector<128x128xf32>
    %cst_13 = arith.constant dense<0.000000e+00> : vector<16x128xf32>
    %10 = tpu.matmul %0, %9, %cst_13 {dimension_numbers = #tpu.dot_dimension_numbers<[1], [0], [0], [1], [0, 0, 1, 1], [], []>} : vector<16x128xf32>, vector<128x128xf32>, vector<16x128xf32> -> vector<16x128xf32>
    %11 = arith.addf %8, %10 : vector<16x128xf32>
    %c0_14 = arith.constant 0 : index
    %c0_15 = arith.constant 0 : index
    %12 = vector.load %arg7[%c0_14, %c0_15] : memref<128x128xf32, #tpu.memory_space<vmem>>, vector<128x128xf32>
    %cst_16 = arith.constant dense<0.000000e+00> : vector<16x128xf32>
    %13 = tpu.matmul %1, %12, %cst_16 {dimension_numbers = #tpu.dot_dimension_numbers<[1], [0], [0], [1], [0, 0, 1, 1], [], []>} : vector<16x128xf32>, vector<128x128xf32>, vector<16x128xf32> -> vector<16x128xf32>
    %14 = arith.addf %11, %13 : vector<16x128xf32>
    %c0_17 = arith.constant 0 : index
    %c0_18 = arith.constant 0 : index
    %15 = vector.load %arg8[%c0_17, %c0_18] : memref<1x128xf32, #tpu.memory_space<vmem>>, vector<1x128xf32>
    %16 = vector.broadcast %15 : vector<1x128xf32> to vector<16x128xf32>
    %17 = arith.addf %14, %16 : vector<16x128xf32>
    %c0_19 = arith.constant 0 : index
    %c0_20 = arith.constant 0 : index
    %18 = vector.load %arg9[%c0_19, %c0_20] : memref<16x128xf32, #tpu.memory_space<vmem>>, vector<16x128xf32>
    tpu.vector_store %arg9[%c0_19, %c0_20], %17 {strides = array<i32>} : memref<16x128xf32, #tpu.memory_space<vmem>>, vector<16x128xf32>,
    return
  }
  func.func @transform_0(%arg0: i32) -> (i32, i32) {
    %c0_i32 = arith.constant 0 : i32
    %c0_i32_0 = arith.constant 0 : i32
    return %arg0, %c0_i32 : i32, i32
  }
  func.func @transform_1(%arg0: i32) -> (i32, i32) {
    %c0_i32 = arith.constant 0 : i32
    %c0_i32_0 = arith.constant 0 : i32
    return %arg0, %c0_i32 : i32, i32
  }
  func.func @transform_2(%arg0: i32) -> (i32, i32) {
    %c0_i32 = arith.constant 0 : i32
    %c0_i32_0 = arith.constant 0 : i32
    %c0_i32_1 = arith.constant 0 : i32
    return %c0_i32, %c0_i32_0 : i32, i32
  }
  func.func @transform_3(%arg0: i32) -> (i32, i32) {
    %c0_i32 = arith.constant 0 : i32
    %c0_i32_0 = arith.constant 0 : i32
    %c0_i32_1 = arith.constant 0 : i32
    return %c0_i32, %c0_i32_0 : i32, i32
  }
  func.func @transform_4(%arg0: i32) -> (i32, i32) {
    %c0_i32 = arith.constant 0 : i32
    %c0_i32_0 = arith.constant 0 : i32
    %c0_i32_1 = arith.constant 0 : i32
    return %c0_i32, %c0_i32_0 : i32, i32
  }
  func.func @transform_5(%arg0: i32) -> (i32, i32) {
    %c0_i32 = arith.constant 0 : i32
    %c0_i32_0 = arith.constant 0 : i32
    %c0_i32_1 = arith.constant 0 : i32
    return %c0_i32, %c0_i32_0 : i32, i32
  }
  func.func @transform_6(%arg0: i32) -> (i32, i32) {
    %c0_i32 = arith.constant 0 : i32
    %c0_i32_0 = arith.constant 0 : i32
    %c0_i32_1 = arith.constant 0 : i32
    return %c0_i32, %c0_i32_0 : i32, i32
  }
  func.func @transform_7(%arg0: i32) -> (i32, i32) {
    %c0_i32 = arith.constant 0 : i32
    %c0_i32_0 = arith.constant 0 : i32
    %c0_i32_1 = arith.constant 0 : i32
    return %c0_i32, %c0_i32_0 : i32, i32
  }
  func.func @transform_8(%arg0: i32) -> (i32, i32) {
    %c0_i32 = arith.constant 0 : i32
    %c0_i32_0 = arith.constant 0 : i32
    return %arg0, %c0_i32 : i32, i32
  }
}

module attributes {stable_mosaic.version = 11 : i64} {
  func.func @_compose_bilinear_kernel(%arg0: i32, %arg1: memref<16x128xf32, #tpu.memory_space<vmem>>, %arg2: memref<16x128xf32, #tpu.memory_space<vmem>>, %arg3: memref<128x128xf32, #tpu.memory_space<vmem>>, %arg4: memref<128x128xf32, #tpu.memory_space<vmem>>, %arg5: memref<128x128xf32, #tpu.memory_space<vmem>>, %arg6: memref<128x128xf32, #tpu.memory_space<vmem>>, %arg7: memref<128x128xf32, #tpu.memory_space<vmem>>, %arg8: memref<1x128xf32, #tpu.memory_space<vmem>>, %arg9: memref<16x128xf32, #tpu.memory_space<vmem>>) attributes {dimension_semantics = [#tpu.dimension_semantics<parallel>], iteration_bounds = array<i64: 1>, scalar_prefetch = 0 : i64, scratch_operands = 0 : i64, tpu.core_type = #tpu.core_type<tc>, window_params = [{transform_indices = @transform_0, window_bounds = array<i64: 16, 128>}, {transform_indices = @transform_1, window_bounds = array<i64: 16, 128>}, {pipeline_mode = #tpu.pipeline_mode<synchronous>, transform_indices = @transform_2, window_bounds = array<i64: 128, 128>}, {pipeline_mode = #tpu.pipeline_mode<synchronous>, transform_indices = @transform_3, window_bounds = array<i64: 128, 128>}, {pipeline_mode = #tpu.pipeline_mode<synchronous>, transform_indices = @transform_4, window_bounds = array<i64: 128, 128>}, {pipeline_mode = #tpu.pipeline_mode<synchronous>, transform_indices = @transform_5, window_bounds = array<i64: 128, 128>}, {pipeline_mode = #tpu.pipeline_mode<synchronous>, transform_indices = @transform_6, window_bounds = array<i64: 128, 128>}, {pipeline_mode = #tpu.pipeline_mode<synchronous>, transform_indices = @transform_7, window_bounds = array<i64: 1, 128>}, {transform_indices = @transform_8, window_bounds = array<i64: 16, 128>}]} {
    %c0 = arith.constant 0 : index
    %c0_0 = arith.constant 0 : index
    %0 = vector.load %arg1[%c0, %c0_0] : memref<16x128xf32, #tpu.memory_space<vmem>>, vector<16x128xf32>
    %c0_1 = arith.constant 0 : index
    %c0_2 = arith.constant 0 : index
    %1 = vector.load %arg2[%c0_1, %c0_2] : memref<16x128xf32, #tpu.memory_space<vmem>>, vector<16x128xf32>
    %c0_3 = arith.constant 0 : index
    %c0_4 = arith.constant 0 : index
    %2 = vector.load %arg3[%c0_3, %c0_4] : memref<128x128xf32, #tpu.memory_space<vmem>>, vector<128x128xf32>
    %cst = arith.constant dense<0.000000e+00> : vector<16x128xf32>
    %3 = tpu.matmul %0, %2, %cst {dimension_numbers = #tpu.dot_dimension_numbers<[1], [0], [0], [1], [0, 0, 1, 1], [], []>} : vector<16x128xf32>, vector<128x128xf32>, vector<16x128xf32> -> vector<16x128xf32>
    %c0_5 = arith.constant 0 : index
    %c0_6 = arith.constant 0 : index
    %4 = vector.load %arg4[%c0_5, %c0_6] : memref<128x128xf32, #tpu.memory_space<vmem>>, vector<128x128xf32>
    %cst_7 = arith.constant dense<0.000000e+00> : vector<16x128xf32>
    %5 = tpu.matmul %1, %4, %cst_7 {dimension_numbers = #tpu.dot_dimension_numbers<[1], [0], [0], [1], [0, 0, 1, 1], [], []>} : vector<16x128xf32>, vector<128x128xf32>, vector<16x128xf32> -> vector<16x128xf32>
    %6 = arith.mulf %3, %5 : vector<16x128xf32>
    %c0_8 = arith.constant 0 : index
    %c0_9 = arith.constant 0 : index
    %7 = vector.load %arg5[%c0_8, %c0_9] : memref<128x128xf32, #tpu.memory_space<vmem>>, vector<128x128xf32>
    %cst_10 = arith.constant dense<0.000000e+00> : vector<16x128xf32>
    %8 = tpu.matmul %6, %7, %cst_10 {dimension_numbers = #tpu.dot_dimension_numbers<[1], [0], [0], [1], [0, 0, 1, 1], [], []>} : vector<16x128xf32>, vector<128x128xf32>, vector<16x128xf32> -> vector<16x128xf32>
    %c0_11 = arith.constant 0 : index
    %c0_12 = arith.constant 0 : index
    %9 = vector.load %arg6[%c0_11, %c0_12] : memref<128x128xf32, #tpu.memory_space<vmem>>, vector<128x128xf32>
    %cst_13 = arith.constant dense<0.000000e+00> : vector<16x128xf32>
    %10 = tpu.matmul %0, %9, %cst_13 {dimension_numbers = #tpu.dot_dimension_numbers<[1], [0], [0], [1], [0, 0, 1, 1], [], []>} : vector<16x128xf32>, vector<128x128xf32>, vector<16x128xf32> -> vector<16x128xf32>
    %11 = arith.addf %8, %10 : vector<16x128xf32>
    %c0_14 = arith.constant 0 : index
    %c0_15 = arith.constant 0 : index
    %12 = vector.load %arg7[%c0_14, %c0_15] : memref<128x128xf32, #tpu.memory_space<vmem>>, vector<128x128xf32>
    %cst_16 = arith.constant dense<0.000000e+00> : vector<16x128xf32>
    %13 = tpu.matmul %1, %12, %cst_16 {dimension_numbers = #tpu.dot_dimension_numbers<[1], [0], [0], [1], [0, 0, 1, 1], [], []>} : vector<16x128xf32>, vector<128x128xf32>, vector<16x128xf32> -> vector<16x128xf32>
    %14 = arith.addf %11, %13 : vector<16x128xf32>
    %c0_17 = arith.constant 0 : index
    %c0_18 = arith.constant 0 : index
    %15 = vector.load %arg8[%c0_17, %c0_18] : memref<1x128xf32, #tpu.memory_space<vmem>>, vector<1x128xf32>
    %16 = vector.broadcast %15 : vector<1x128xf32> to vector<16x128xf32>
    %17 = arith.addf %14, %16 : vector<16x128xf32>
    %c0_19 = arith.constant 0 : index
    %c0_20 = arith.constant 0 : index
    %18 = vector.load %arg9[%c0_19, %c0_20] : memref<16x128xf32, #tpu.memory_space<vmem>>, vector<16x128xf32>
    tpu.vector_store %arg9[%c0_19, %c0_20], %17 {strides = array<i32>} : memref<16x128xf32, #tpu.memory_space<vmem>>, vector<16x128xf32>,
    return
  }
  func.func @transform_0(%arg0: i32) -> (i32, i32) {
    %c0_i32 = arith.constant 0 : i32
    %c0_i32_0 = arith.constant 0 : i32
    return %arg0, %c0_i32 : i32, i32
  }
  func.func @transform_1(%arg0: i32) -> (i32, i32) {
    %c0_i32 = arith.constant 0 : i32
    %c0_i32_0 = arith.constant 0 : i32
    return %arg0, %c0_i32 : i32, i32
  }
  func.func @transform_2(%arg0: i32) -> (i32, i32) {
    %c0_i32 = arith.constant 0 : i32
    %c0_i32_0 = arith.constant 0 : i32
    %c0_i32_1 = arith.constant 0 : i32
    return %c0_i32, %c0_i32_0 : i32, i32
  }
  func.func @transform_3(%arg0: i32) -> (i32, i32) {
    %c0_i32 = arith.constant 0 : i32
    %c0_i32_0 = arith.constant 0 : i32
    %c0_i32_1 = arith.constant 0 : i32
    return %c0_i32, %c0_i32_0 : i32, i32
  }
  func.func @transform_4(%arg0: i32) -> (i32, i32) {
    %c0_i32 = arith.constant 0 : i32
    %c0_i32_0 = arith.constant 0 : i32
    %c0_i32_1 = arith.constant 0 : i32
    return %c0_i32, %c0_i32_0 : i32, i32
  }
  func.func @transform_5(%arg0: i32) -> (i32, i32) {
    %c0_i32 = arith.constant 0 : i32
    %c0_i32_0 = arith.constant 0 : i32
    %c0_i32_1 = arith.constant 0 : i32
    return %c0_i32, %c0_i32_0 : i32, i32
  }
  func.func @transform_6(%arg0: i32) -> (i32, i32) {
    %c0_i32 = arith.constant 0 : i32
    %c0_i32_0 = arith.constant 0 : i32
    %c0_i32_1 = arith.constant 0 : i32
    return %c0_i32, %c0_i32_0 : i32, i32
  }
  func.func @transform_7(%arg0: i32) -> (i32, i32) {
    %c0_i32 = arith.constant 0 : i32
    %c0_i32_0 = arith.constant 0 : i32
    %c0_i32_1 = arith.constant 0 : i32
    return %c0_i32, %c0_i32_0 : i32, i32
  }
  func.func @transform_8(%arg0: i32) -> (i32, i32) {
    %c0_i32 = arith.constant 0 : i32
    %c0_i32_0 = arith.constant 0 : i32
    return %arg0, %c0_i32 : i32, i32
  }
}

</mosaic_0001>

<bundles_post_ra>
// kernel: tpu_custom_call.1
= control target key start
LH: loop header
LB: loop body
LE: loop exit
PB: predicated region body
PF: predicated region fallthrough
CT: control target
= control target key end

     0   :  { %13 = vsyncpa [#allocation3], 0  ;;  %s1452_s0 = inlined_call_operand.hbm [shape: f32[16,128], index: 0, kind: input, shape index: {}]   ;;  %s1453_s1 = inlined_call_operand.hbm [shape: f32[16,128], index: 1, kind: input, shape index: {}]   ;;  %s1454_s2 = inlined_call_operand.hbm [shape: f32[128,128], index: 2, kind: input, shape index: {}]   ;;  %s1455_s3 = inlined_call_operand.hbm [shape: f32[128,128], index: 3, kind: input, shape index: {}]   ;;  %s1456_s4 = inlined_call_operand.hbm [shape: f32[128,128], index: 4, kind: input, shape index: {}]   ;;  %s1457_s5 = inlined_call_operand.hbm [shape: f32[128,128], index: 5, kind: input, shape index: {}]   ;;  %s1458_s6 = inlined_call_operand.hbm [shape: f32[128,128], index: 6, kind: input, shape index: {}]   ;;  %s1459_s7 = inlined_call_operand.vmem [shape: f32[1,128], index: 7, kind: input, shape index: {}]   ;;  %s1460_s8 = inlined_call_operand.hbm [shape: f32[16,128], index: 8, kind: output, shape index: {}]  }
   0x1   :  { %14 = vsyncpa [#allocation6], 0 }
   0x2   :  { %15 = vsyncpa [#allocation9], 0 }
   0x3   :  { %16 = vsyncpa [#allocation12], 0 }
   0x4   :  { %17 = vsyncpa [#allocation4], 0  ;;  %s1245_s27 = smov [#allocation5]   ;;  %s1246_s29 = smov [#allocation8]  }
   0x5   :  { %s35_s28 = sshll.u32 %s1245_s27, 4  ;;  %s59_s30 = sshll.u32 %s1246_s29, 4  ;;  %s36_s28 = int_to_ptr.vmem [resolvable:$true] %s35_s28  ;;  %s1300_s30 = int_to_ptr.vmem [resolvable:$true] %s59_s30 }
   0x6   :  { %s1059_s11 = scalar_lea.hbm %s1453_s1, 256 }
   0x7   :  { %p1060_p0 = scmp.ne.s32.totalorder %s1453_s1, %s1059_s11  ;;  %p1063_p1 = scmp.lt.u32.totalorder %s1059_s11, %s1453_s1 }
   0x9   :  { %p1065_p2 = pnand %p1063_p1, %p1060_p0 }
   0xb   :  { %1068 = shalt.err (!%p1065_p2)
}
   0xc   :  { %s1069_s16 = scalar_lea.vmem %s36_s28, 256  ;;  %p1074_p4 = scmp.lt.s32.totalorder %s36_s28, %s36_s28 }
   0xd   :  { %p1070_p3 = scmp.ne.s32.totalorder %s36_s28, %s1069_s16  ;;  %p1075_p5 = scmp.lt.s32.totalorder %s1069_s16, %s1069_s16 }
   0xf   :  { %p1076_p6 = por %p1075_p5, %p1074_p4 }
  0x11   :  { %p1077_p7 = pnand %p1076_p6, %p1070_p3 }
  0x13   :  { %1080 = shalt.err (!%p1077_p7)
}
  0x14   :  { %s1247_s17 = smov 128   ;;  %s1248_s18 = smov 8  }
  0x15   :  { %41 = dma.hbm_to_vmem [thread:$0]  %s1453_s1, 256, %s36_s28, [#allocation6], %s1247_s17, %s1247_s17, %s1248_s18  }
  0x16   :  { %s1081_s23 = scalar_lea.hbm %s1455_s3, 2048 }
  0x17   :  { %p1082_p8 = scmp.ne.s32.totalorder %s1455_s3, %s1081_s23  ;;  %p1085_p9 = scmp.lt.u32.totalorder %s1081_s23, %s1455_s3 }
  0x19   :  { %p1087_p10 = pnand %p1085_p9, %p1082_p8 }
  0x1b   :  { %1090 = shalt.err (!%p1087_p10)
}
  0x1c   :  { %s1091_s29 = scalar_lea.vmem %s1300_s30, 2048  ;;  %p1096_p12 = scmp.lt.s32.totalorder %s1300_s30, %s1300_s30 }
  0x1d   :  { %p1092_p11 = scmp.ne.s32.totalorder %s1300_s30, %s1091_s29  ;;  %p1097_p13 = scmp.lt.s32.totalorder %s1091_s29, %s1091_s29 }
  0x1f   :  { %p1098_p0 = por %p1097_p13, %p1096_p12 }
  0x21   :  { %p1099_p1 = pnand %p1098_p0, %p1092_p11 }
  0x23   :  { %1102 = shalt.err (!%p1099_p1)
}
  0x24   :  { %65 = dma.hbm_to_vmem [thread:$0]  %s1455_s3, 2048, %s1300_s30, [#allocation9], %s1247_s17, %s1247_s17, %s1248_s18  }
  0x25   :  { %s1249_s9 = smov [#allocation11]   ;;  %s1250_s11 = smov [#allocation2]  }
  0x26   :  { %s83_s10 = sshll.u32 %s1249_s9, 4  ;;  %s23_s12 = sshll.u32 %s1250_s11, 4  ;;  %s84_s10 = int_to_ptr.vmem [resolvable:$true] %s83_s10  ;;  %s1337_s12 = int_to_ptr.vmem [resolvable:$true] %s23_s12 }
  0x27   :  { %s1103_s15 = scalar_lea.hbm %s1457_s5, 2048 }
  0x28   :  { %p1104_p2 = scmp.ne.s32.totalorder %s1457_s5, %s1103_s15  ;;  %p1107_p3 = scmp.lt.u32.totalorder %s1103_s15, %s1457_s5 }
  0x2a   :  { %p1109_p4 = pnand %p1107_p3, %p1104_p2 }
  0x2c   :  { %1112 = shalt.err (!%p1109_p4)
}
  0x2d   :  { %s1113_s3 = scalar_lea.vmem %s84_s10, 2048  ;;  %p1118_p6 = scmp.lt.s32.totalorder %s84_s10, %s84_s10 }
  0x2e   :  { %p1114_p5 = scmp.ne.s32.totalorder %s84_s10, %s1113_s3  ;;  %p1119_p7 = scmp.lt.s32.totalorder %s1113_s3, %s1113_s3 }
  0x30   :  { %p1120_p8 = por %p1119_p7, %p1118_p6 }
  0x32   :  { %p1121_p9 = pnand %p1120_p8, %p1114_p5 }
  0x34   :  { %1124 = shalt.err (!%p1121_p9)
}
  0x35   :  { %89 = dma.hbm_to_vmem [thread:$0]  %s1457_s5, 2048, %s84_s10, [#allocation12], %s1247_s17, %s1247_s17, %s1248_s18  }
  0x36   :  { %s1125_s25 = scalar_lea.hbm %s1452_s0, 256 }
  0x37   :  { %p1126_p10 = scmp.ne.s32.totalorder %s1452_s0, %s1125_s25  ;;  %p1129_p11 = scmp.lt.u32.totalorder %s1125_s25, %s1452_s0 }
  0x39   :  { %p1131_p12 = pnand %p1129_p11, %p1126_p10 }
  0x3b   :  { %1134 = shalt.err (!%p1131_p12)
}
  0x3c   :  { %s1135_s28 = scalar_lea.vmem %s1337_s12, 256  ;;  %p1140_p0 = scmp.lt.s32.totalorder %s1337_s12, %s1337_s12 }
  0x3d   :  { %p1136_p13 = scmp.ne.s32.totalorder %s1337_s12, %s1135_s28  ;;  %p1141_p1 = scmp.lt.s32.totalorder %s1135_s28, %s1135_s28 }
  0x3f   :  { %p1142_p2 = por %p1141_p1, %p1140_p0 }
  0x41   :  { %p1143_p3 = pnand %p1142_p2, %p1136_p13 }
  0x43   :  { %1146 = shalt.err (!%p1143_p3)
}
  0x44   :  { %29 = dma.hbm_to_vmem [thread:$0]  %s1452_s0, 256, %s1337_s12, [#allocation3], %s1247_s17, %s1247_s17, %s1248_s18  }
  0x45   :  { %s1251_s10 = smov [#allocation7]   ;;  %s1252_s13 = smov [#allocation10]  }
  0x46   :  { %s47_s11 = sshll.u32 %s1251_s10, 4  ;;  %s71_s14 = sshll.u32 %s1252_s13, 4  ;;  %s48_s11 = int_to_ptr.vmem [resolvable:$true] %s47_s11  ;;  %s1374_s14 = int_to_ptr.vmem [resolvable:$true] %s71_s14 }
  0x47   :  { %s1147_s19 = scalar_lea.hbm %s1454_s2, 2048 }
  0x48   :  { %p1148_p4 = scmp.ne.s32.totalorder %s1454_s2, %s1147_s19  ;;  %p1151_p5 = scmp.lt.u32.totalorder %s1147_s19, %s1454_s2 }
  0x4a   :  { %p1153_p6 = pnand %p1151_p5, %p1148_p4 }
  0x4c   :  { %1156 = shalt.err (!%p1153_p6)
}
  0x4d   :  { %s1157_s0 = scalar_lea.vmem %s48_s11, 2048  ;;  %p1162_p8 = scmp.lt.s32.totalorder %s48_s11, %s48_s11 }
  0x4e   :  { %p1158_p7 = scmp.ne.s32.totalorder %s48_s11, %s1157_s0  ;;  %p1163_p9 = scmp.lt.s32.totalorder %s1157_s0, %s1157_s0 }
  0x50   :  { %p1164_p10 = por %p1163_p9, %p1162_p8 }
  0x52   :  { %p1165_p11 = pnand %p1164_p10, %p1158_p7 }
  0x54   :  { %1168 = shalt.err (!%p1165_p11)
}
  0x55   :  { %53 = dma.hbm_to_vmem [thread:$0]  %s1454_s2, 2048, %s48_s11, [#allocation6], %s1247_s17, %s1247_s17, %s1248_s18  }
  0x56   :  { %s1169_s25 = scalar_lea.hbm %s1456_s4, 2048 }
  0x57   :  { %p1170_p12 = scmp.ne.s32.totalorder %s1456_s4, %s1169_s25  ;;  %p1173_p13 = scmp.lt.u32.totalorder %s1169_s25, %s1456_s4 }
  0x59   :  { %p1175_p0 = pnand %p1173_p13, %p1170_p12 }
  0x5b   :  { %1178 = shalt.err (!%p1175_p0)
}
  0x5c   :  { %s1179_s28 = scalar_lea.vmem %s1374_s14, 2048  ;;  %p1184_p2 = scmp.lt.s32.totalorder %s1374_s14, %s1374_s14 }
  0x5d   :  { %p1180_p1 = scmp.ne.s32.totalorder %s1374_s14, %s1179_s28  ;;  %p1185_p3 = scmp.lt.s32.totalorder %s1179_s28, %s1179_s28 }
  0x5f   :  { %p1186_p4 = por %p1185_p3, %p1184_p2 }
  0x61   :  { %p1187_p5 = pnand %p1186_p4, %p1180_p1 }
  0x63   :  { %1190 = shalt.err (!%p1187_p5)
}
  0x64   :  { %77 = dma.hbm_to_vmem [thread:$0]  %s1456_s4, 2048, %s1374_s14, [#allocation9], %s1247_s17, %s1247_s17, %s1248_s18  }
  0x65   :  { %s1253_s9 = smov [#allocation13]   ;;  %s1191_s15 = scalar_lea.hbm %s1458_s6, 2048 }
  0x66   :  { %s95_s10 = sshll.u32 %s1253_s9, 4  ;;  %p1192_p6 = scmp.ne.s32.totalorder %s1458_s6, %s1191_s15  ;;  %s96_s10 = int_to_ptr.vmem [resolvable:$true] %s95_s10 }
  0x67   :  { %p1195_p7 = scmp.lt.u32.totalorder %s1191_s15, %s1458_s6 }
  0x69   :  { %p1197_p8 = pnand %p1195_p7, %p1192_p6 }
  0x6b   :  { %1200 = shalt.err (!%p1197_p8)
}
  0x6c   :  { %s1201_s3 = scalar_lea.vmem %s96_s10, 2048  ;;  %p1206_p10 = scmp.lt.s32.totalorder %s96_s10, %s96_s10 }
  0x6d   :  { %p1202_p9 = scmp.ne.s32.totalorder %s96_s10, %s1201_s3  ;;  %p1207_p11 = scmp.lt.s32.totalorder %s1201_s3, %s1201_s3 }
  0x6f   :  { %p1208_p12 = por %p1207_p11, %p1206_p10 }
  0x71   :  { %p1209_p13 = pnand %p1208_p12, %p1202_p9 }
  0x73   :  { %1212 = shalt.err (!%p1209_p13)
}
  0x74   :  { %101 = dma.hbm_to_vmem [thread:$0]  %s1458_s6, 2048, %s96_s10, [#allocation12], %s1247_s17, %s1247_s17, %s1248_s18  }
  0x75   :  { %1235 = dma.done.wait [#allocation3], 256  }
  0x76   :  { %1236 = vsyncadd [#allocation3], 4294967040 }
  0x77   :  { %1237 = dma.done.wait [#allocation6], 2304  }
  0x78   :  { %1238 = vsyncadd [#allocation6], 4294964992 }
  0x79   :  { %1239 = dma.done.wait [#allocation9], 4096  }
  0x7a   :  { %1240 = vsyncadd [#allocation9], 4294963200 }
  0x7b   :  { %1241 = dma.done.wait [#allocation12], 4096  }
  0x7c   :  { %1242 = vsyncadd [#allocation12], 4294963200  ;;  %v129_v0 = vld [vmem:[#allocation7] sm:$0xff]  ;;  %v130_v1 = vld [vmem:[#allocation7 + $0x8] sm:$0xff]  ;;  %s1254_s0 = smov [#allocation14]  }
  0x7d   :  { %v131_v2 = vld [vmem:[#allocation7 + $0x10] sm:$0xff]  ;;  %v885_v3 = vpack.c.bf16 %v130_v1, %v129_v0  ;;  %v132_v4 = vld [vmem:[#allocation7 + $0x18] sm:$0xff]  ;;  %v133_v6 = vld [vmem:[#allocation7 + $0x20] sm:$0xff]  ;;  %s604_s12 = sshll.u32 %s1254_s0, 4  ;;  %s605_s12 = int_to_ptr.vmem [resolvable:$true] %s604_s12 }
  0x7e   :  { %v889_v5 = vpack.c.bf16 %v132_v4, %v131_v2  ;;  %v134_v7 = vld [vmem:[#allocation7 + $0x28] sm:$0xff]  ;;  %v125_v9 = vld [vmem:[#allocation2] sm:$0xff]  ;;  %v135_v10 = vld [vmem:[#allocation7 + $0x30] sm:$0xff]  ;;  %s1213_s22 = scalar_lea.vmem %s605_s12, 256  ;;  %p1218_p1 = scmp.lt.s32.totalorder %s605_s12, %s605_s12 }
  0x7f   :  { %886 = vmatprep.subr.bf16.mxu1 %v885_v3  ;;  %v893_v8 = vpack.c.bf16 %v134_v7, %v133_v6  ;;  %v136_v11 = vld [vmem:[#allocation7 + $0x38] sm:$0xff]  ;;  %742 = vmatprep.mubr.f32.mxu1 %v125_v9  ;;  %v137_v13 = vld [vmem:[#allocation7 + $0x40] sm:$0xff]  ;;  %v138_v14 = vld [vmem:[#allocation7 + $0x48] sm:$0xff]  ;;  %p1214_p0 = scmp.ne.s32.totalorder %s605_s12, %s1213_s22  ;;  %p1219_p2 = scmp.lt.s32.totalorder %s1213_s22, %s1213_s22 }
  0x80   :  { %888 = vmatpush3.bf16.msra.mxu1 %v885_v3  ;;  %812 = vmatprep.mubr.f32.mxu0 %v125_v9  ;;  %v897_v12 = vpack.c.bf16 %v136_v11, %v135_v10  ;;  %v329_v15 = vld [vmem:[#allocation11] sm:$0xff]  ;;  %v330_v16 = vld [vmem:[#allocation11 + $0x8] sm:$0xff]  ;;  %v331_v17 = vld [vmem:[#allocation11 + $0x10] sm:$0xff]  ;;  %v901_v18 = vpack.c.bf16 %v138_v14, %v137_v13 }
  0x81   :  { %890 = vmatprep.subr.bf16.mxu1 %v889_v5  ;;  %v139_v19 = vld [vmem:[#allocation7 + $0x50] sm:$0xff]  ;;  %v949_v20 = vpack.c.bf16 %v330_v16, %v329_v15  ;;  %v332_v21 = vld [vmem:[#allocation11 + $0x18] sm:$0xff]  ;;  %v333_v24 = vld [vmem:[#allocation11 + $0x20] sm:$0xff]  ;;  %p1220_p3 = por %p1219_p2, %p1218_p1 }
  0x82   :  { %v140_v22 = vld [vmem:[#allocation7 + $0x58] sm:$0xff]  ;;  %v953_v23 = vpack.c.bf16 %v332_v21, %v331_v17  ;;  %v334_v25 = vld [vmem:[#allocation11 + $0x28] sm:$0xff]  ;;  %v141_v27 = vld [vmem:[#allocation7 + $0x60] sm:$0xff] }
  0x83   :  { %950 = vmatprep.subr.bf16.mxu0 %v949_v20  ;;  %v905_v26 = vpack.c.bf16 %v140_v22, %v139_v19  ;;  %v957_v28 = vpack.c.bf16 %v334_v25, %v333_v24  ;;  %v142_v29 = vld [vmem:[#allocation7 + $0x68] sm:$0xff]  ;;  %v335_v30 = vld [vmem:[#allocation11 + $0x30] sm:$0xff]  ;;  %v336_v31 = vld [vmem:[#allocation11 + $0x38] sm:$0xff]  ;;  %p1221_p4 = pnand %p1220_p3, %p1214_p0 }
  0x84   :  { %892 = vmatpush3.bf16.msra.mxu1 %v889_v5  ;;  %952 = vmatpush3.bf16.msra.mxu0 %v949_v20  ;;  %v909_v32 = vpack.c.bf16 %v142_v29, %v141_v27  ;;  %v143_v33 = vld [vmem:[#allocation7 + $0x70] sm:$0xff]  ;;  %v961_v34 = vpack.c.bf16 %v336_v31, %v335_v30  ;;  %v144_v35 = vld [vmem:[#allocation7 + $0x78] sm:$0xff]  ;;  %v337_v36 = vld [vmem:[#allocation11 + $0x40] sm:$0xff] }
  0x85   :  { %894 = vmatprep.subr.bf16.mxu1 %v893_v8  ;;  %954 = vmatprep.subr.bf16.mxu0 %v953_v23  ;;  %v338_v37 = vld [vmem:[#allocation11 + $0x48] sm:$0xff]  ;;  %v913_v38 = vpack.c.bf16 %v144_v35, %v143_v33  ;;  %v220_v39 = vld [vmem:[#allocation8] sm:$0xff]  ;;  %v339_v42 = vld [vmem:[#allocation11 + $0x50] sm:$0xff] }
  0x86   :  { %v965_v40 = vpack.c.bf16 %v338_v37, %v337_v36  ;;  %v221_v41 = vld [vmem:[#allocation8 + $0x8] sm:$0xff]  ;;  %v340_v43 = vld [vmem:[#allocation11 + $0x58] sm:$0xff]  ;;  %v222_v46 = vld [vmem:[#allocation8 + $0x10] sm:$0xff] }
  0x87   :  { %v917_v44 = vpack.c.bf16 %v221_v41, %v220_v39  ;;  %v969_v45 = vpack.c.bf16 %v340_v43, %v339_v42  ;;  %v223_v47 = vld [vmem:[#allocation8 + $0x18] sm:$0xff]  ;;  %v341_v48 = vld [vmem:[#allocation11 + $0x60] sm:$0xff]  ;;  %v342_v49 = vld [vmem:[#allocation11 + $0x68] sm:$0xff] }
  0x88   :  { %896 = vmatpush3.bf16.msra.mxu1 %v893_v8  ;;  %956 = vmatpush3.bf16.msra.mxu0 %v953_v23  ;;  %v126_v50 = vld [vmem:[#allocation2 + $0x8] sm:$0xff]  ;;  %v921_v51 = vpack.c.bf16 %v223_v47, %v222_v46  ;;  %v1426_v52 = vld [vmem:[#allocation5] sm:$0xff]  ;;  %v224_v53 = vld [vmem:[#allocation8 + $0x20] sm:$0xff]  ;;  %v973_v55 = vpack.c.bf16 %v342_v49, %v341_v48 }
  0x89   :  { %898 = vmatprep.subr.bf16.mxu1 %v897_v12  ;;  %958 = vmatprep.subr.bf16.mxu0 %v957_v28  ;;  %v225_v54 = vld [vmem:[#allocation8 + $0x28] sm:$0xff]  ;;  %v226_v57 = vld [vmem:[#allocation8 + $0x30] sm:$0xff]  ;;  %v227_v58 = vld [vmem:[#allocation8 + $0x38] sm:$0xff] }
  0x8a   :  { %v925_v56 = vpack.c.bf16 %v225_v54, %v224_v53  ;;  %v929_v59 = vpack.c.bf16 %v227_v58, %v226_v57  ;;  %v228_v60 = vld [vmem:[#allocation8 + $0x40] sm:$0xff]  ;;  %v229_v61 = vld [vmem:[#allocation8 + $0x48] sm:$0xff]  ;;  %v230_v63 = vld [vmem:[#allocation8 + $0x50] sm:$0xff] }
  0x8b   :  { %v933_v62 = vpack.c.bf16 %v229_v61, %v228_v60  ;;  %v231_v0 = vld [vmem:[#allocation8 + $0x58] sm:$0xff]  ;;  %v232_v2 = vld [vmem:[#allocation8 + $0x60] sm:$0xff]  ;;  %v233_v3 = vld [vmem:[#allocation8 + $0x68] sm:$0xff] }
  0x8c   :  { %900 = vmatpush3.bf16.msra.mxu1 %v897_v12  ;;  %960 = vmatpush3.bf16.msra.mxu0 %v957_v28  ;;  %v937_v1 = vpack.c.bf16 %v231_v0, %v230_v63  ;;  %v941_v4 = vpack.c.bf16 %v233_v3, %v232_v2  ;;  %v234_v5 = vld [vmem:[#allocation8 + $0x70] sm:$0xff]  ;;  %v235_v6 = vld [vmem:[#allocation8 + $0x78] sm:$0xff]  ;;  %v313_v12 = vld [vmem:[#allocation10] sm:$0xff] }
  0x8d   :  { %902 = vmatprep.subr.bf16.mxu1 %v901_v18  ;;  %962 = vmatprep.subr.bf16.mxu0 %v961_v34  ;;  %v945_v7 = vpack.c.bf16 %v235_v6, %v234_v5  ;;  %v1429_v8 = vld [vmem:[#allocation5 + $0x8] sm:$0xff]  ;;  %v343_v9 = vld [vmem:[#allocation11 + $0x70] sm:$0xff]  ;;  %v314_v13 = vld [vmem:[#allocation10 + $0x8] sm:$0xff] }
  0x8e   :  { %v344_v10 = vld [vmem:[#allocation11 + $0x78] sm:$0xff]  ;;  %v315_v14 = vld [vmem:[#allocation10 + $0x10] sm:$0xff]  ;;  %v981_v15 = vpack.c.bf16 %v314_v13, %v313_v12  ;;  %v318_v19 = vld [vmem:[#allocation10 + $0x28] sm:$0xff] }
  0x8f   :  { %v977_v11 = vpack.c.bf16 %v344_v10, %v343_v9  ;;  %v316_v16 = vld [vmem:[#allocation10 + $0x18] sm:$0xff]  ;;  %v319_v21 = vld [vmem:[#allocation10 + $0x30] sm:$0xff]  ;;  %v321_v24 = vld [vmem:[#allocation10 + $0x40] sm:$0xff] }
  0x90   :  { %904 = vmatpush3.bf16.msra.mxu1 %v901_v18  ;;  %964 = vmatpush3.bf16.msra.mxu0 %v961_v34  ;;  %v985_v17 = vpack.c.bf16 %v316_v16, %v315_v14  ;;  %v317_v18 = vld [vmem:[#allocation10 + $0x20] sm:$0xff]  ;;  %v320_v22 = vld [vmem:[#allocation10 + $0x38] sm:$0xff]  ;;  %v322_v25 = vld [vmem:[#allocation10 + $0x48] sm:$0xff] }
  0x91   :  { %906 = vmatprep.subr.bf16.mxu1 %v905_v26  ;;  %966 = vmatprep.subr.bf16.mxu0 %v965_v40  ;;  %v989_v20 = vpack.c.bf16 %v318_v19, %v317_v18  ;;  %v993_v23 = vpack.c.bf16 %v320_v22, %v319_v21  ;;  %v323_v27 = vld [vmem:[#allocation10 + $0x50] sm:$0xff]  ;;  %v324_v28 = vld [vmem:[#allocation10 + $0x58] sm:$0xff]  ;;  %v325_v30 = vld [vmem:[#allocation10 + $0x60] sm:$0xff] }
  0x92   :  { %v1001_v29 = vpack.c.bf16 %v324_v28, %v323_v27  ;;  %v326_v31 = vld [vmem:[#allocation10 + $0x68] sm:$0xff]  ;;  %v327_v33 = vld [vmem:[#allocation10 + $0x70] sm:$0xff]  ;;  %v328_v34 = vld [vmem:[#allocation10 + $0x78] sm:$0xff] }
  0x93   :  { %v1009_v35 = vpack.c.bf16 %v328_v34, %v327_v33  ;;  %v495_v36 = vld [vmem:[#allocation13] sm:$0xff]  ;;  %v496_v37 = vld [vmem:[#allocation13 + $0x8] sm:$0xff]  ;;  %v497_v42 = vld [vmem:[#allocation13 + $0x10] sm:$0xff] }
  0x94   :  { %908 = vmatpush3.bf16.msra.mxu1 %v905_v26  ;;  %968 = vmatpush3.bf16.msra.mxu0 %v965_v40  ;;  %v997_v26 = vpack.c.bf16 %v322_v25, %v321_v24  ;;  %v498_v43 = vld [vmem:[#allocation13 + $0x18] sm:$0xff]  ;;  %v499_v48 = vld [vmem:[#allocation13 + $0x20] sm:$0xff]  ;;  %v500_v49 = vld [vmem:[#allocation13 + $0x28] sm:$0xff] }
  0x95   :  { %910 = vmatprep.subr.bf16.mxu1 %v909_v32  ;;  %970 = vmatprep.subr.bf16.mxu0 %v969_v45  ;;  %v1017_v47 = vpack.c.bf16 %v498_v43, %v497_v42  ;;  %v502_v53 = vld [vmem:[#allocation13 + $0x38] sm:$0xff]  ;;  %v505_v58 = vld [vmem:[#allocation13 + $0x50] sm:$0xff]  ;;  %v507_v61 = vld [vmem:[#allocation13 + $0x60] sm:$0xff] }
  0x96   :  { %v509_v63 = vld [vmem:[#allocation13 + $0x70] sm:$0xff]  ;;  %v510_v0 = vld [vmem:[#allocation13 + $0x78] sm:$0xff]  ;;  %v619_v2 = vld [vmem:[%s1459_s7] ss:$0 sm:$0xff] }
  0x98   :  { %912 = vmatpush3.bf16.msra.mxu1 %v909_v32  ;;  %972 = vmatpush3.bf16.msra.mxu0 %v969_v45  ;;  %v1005_v32 = vpack.c.bf16 %v326_v31, %v325_v30 }
  0x99   :  { %914 = vmatprep.subr.bf16.mxu1 %v913_v38  ;;  %974 = vmatprep.subr.bf16.mxu0 %v973_v55 }
  0x9c   :  { %916 = vmatpush3.bf16.msra.mxu1 %v913_v38  ;;  %976 = vmatpush3.bf16.msra.mxu0 %v973_v55  ;;  %v1013_v38 = vpack.c.bf16 %v496_v37, %v495_v36  ;;  %v503_v55 = vld [vmem:[#allocation13 + $0x40] sm:$0xff] }
  0x9d   :  { %918 = vmatprep.subr.bf16.mxu1 %v917_v44  ;;  %978 = vmatprep.subr.bf16.mxu0 %v977_v11 }
  0x9f   :  { %743 = vmatmul.mubr.f32.vlgmr.msra.gmra.mrb[0].mxu1 %v126_v50 }
  0xa0   :  { %920 = vmatpush3.bf16.msra.mxu1 %v917_v44  ;;  %777 = vmatprep.mubr.f32.mxu1 %v1426_v52 }
  0xa1   :  { %922 = vmatprep.subr.bf16.mxu1 %v921_v51  ;;  %980 = vmatpush3.bf16.msra.mxu0 %v977_v11 }
  0xa2   :  { %982 = vmatprep.subr.bf16.mxu0 %v981_v15 }
  0xa4   :  { %924 = vmatpush3.bf16.msra.mxu1 %v921_v51  ;;  %813 = vmatmul.mubr.f32.vlgmr.msra.gmra.mrb[0].mxu0 %v126_v50  ;;  %v1021_v50 = vpack.c.bf16 %v500_v49, %v499_v48  ;;  %v501_v51 = vld [vmem:[#allocation13 + $0x30] sm:$0xff] }
  0xa5   :  { %926 = vmatprep.subr.bf16.mxu1 %v925_v56  ;;  %984 = vmatpush3.bf16.msra.mxu0 %v981_v15  ;;  %v1025_v54 = vpack.c.bf16 %v502_v53, %v501_v51 }
  0xa6   :  { %986 = vmatprep.subr.bf16.mxu0 %v985_v17 }
  0xa8   :  { %928 = vmatpush3.bf16.msra.mxu1 %v925_v56  ;;  %v504_v56 = vld [vmem:[#allocation13 + $0x48] sm:$0xff] }
  0xa9   :  { %930 = vmatprep.subr.bf16.mxu1 %v929_v59  ;;  %988 = vmatpush3.bf16.msra.mxu0 %v985_v17  ;;  %v1029_v57 = vpack.c.bf16 %v504_v56, %v503_v55 }
  0xaa   :  { %990 = vmatprep.subr.bf16.mxu0 %v989_v20 }
  0xac   :  { %932 = vmatpush3.bf16.msra.mxu1 %v929_v59  ;;  %v506_v59 = vld [vmem:[#allocation13 + $0x58] sm:$0xff] }
  0xad   :  { %934 = vmatprep.subr.bf16.mxu1 %v933_v62  ;;  %992 = vmatpush3.bf16.msra.mxu0 %v989_v20  ;;  %v1033_v60 = vpack.c.bf16 %v506_v59, %v505_v58 }
  0xae   :  { %994 = vmatprep.subr.bf16.mxu0 %v993_v23 }
  0xb0   :  { %936 = vmatpush3.bf16.msra.mxu1 %v933_v62  ;;  %v508_v62 = vld [vmem:[#allocation13 + $0x68] sm:$0xff] }
  0xb1   :  { %938 = vmatprep.subr.bf16.mxu1 %v937_v1  ;;  %996 = vmatpush3.bf16.msra.mxu0 %v993_v23 }
  0xb2   :  { %998 = vmatprep.subr.bf16.mxu0 %v997_v26 }
  0xb4   :  { %940 = vmatpush3.bf16.msra.mxu1 %v937_v1  ;;  %v1041_v1 = vpack.c.bf16 %v510_v0, %v509_v63 }
  0xb5   :  { %942 = vmatprep.subr.bf16.mxu1 %v941_v4  ;;  %1000 = vmatpush3.bf16.msra.mxu0 %v997_v26 }
  0xb6   :  { %1002 = vmatprep.subr.bf16.mxu0 %v1001_v29 }
  0xb8   :  { %944 = vmatpush3.bf16.msra.mxu1 %v941_v4 }
  0xb9   :  { %946 = vmatprep.subr.bf16.mxu1 %v945_v7  ;;  %1004 = vmatpush3.bf16.msra.mxu0 %v1001_v29 }
  0xba   :  { %1006 = vmatprep.subr.bf16.mxu0 %v1005_v32 }
  0xbc   :  { %948 = vmatpush3.bf16.msra.mxu1 %v945_v7 }
  0xbd   :  { %1008 = vmatpush3.bf16.msra.mxu0 %v1005_v32 }
  0xbe   :  { %1010 = vmatprep.subr.bf16.mxu0 %v1009_v35 }
  0xbf   :  { %778 = vmatmul.mubr.f32.vlgmr.msra.gmra.mrb[2].mxu1 %v1429_v8 }
  0xc1   :  { %1012 = vmatpush3.bf16.msra.mxu0 %v1009_v35 }
  0xc2   :  { %1014 = vmatprep.subr.bf16.mxu0 %v1013_v38 }
 0x172   :  { %v744_v39 = vpop.f32.mrb[0].mxu1 }
 0x173   :  { %v211_v40 = vpop.f32.mrb[1].mxu1 }
 0x192   :  { %v779_v41 = vpop.f32.mrb[2].mxu1 }
 0x193   :  { %v312_v44 = vmul.f32 %v779_v41, %v744_v39  ;;  %v302_v45 = vpop.f32.mrb[3].mxu1 }
 0x194   :  { %v311_v46 = vmul.f32 %v302_v45, %v211_v40 }
 0x196   :  { %847 = vmatprep.mubr.f32.mxu0 %v311_v46 }
 0x197   :  { %848 = vmatmul.mubr.f32.vlgmr.msra.gmra.mrb[0].mxu0 %v312_v44 }
 0x198   :  { %1016 = vmatpush3.bf16.msra.mxu0 %v1013_v38  ;;  %882 = vmatprep.mubr.f32.mxu0 %v1426_v52  ;;  %v1037_v52 = vpack.c.bf16 %v508_v62, %v507_v61 }
 0x199   :  { %1018 = vmatprep.subr.bf16.mxu0 %v1017_v47 }
 0x19c   :  { %1020 = vmatpush3.bf16.msra.mxu0 %v1017_v47 }
 0x19d   :  { %1022 = vmatprep.subr.bf16.mxu0 %v1021_v50 }
 0x1a0   :  { %1024 = vmatpush3.bf16.msra.mxu0 %v1021_v50 }
 0x1a1   :  { %1026 = vmatprep.subr.bf16.mxu0 %v1025_v54 }
 0x1a4   :  { %1028 = vmatpush3.bf16.msra.mxu0 %v1025_v54 }
 0x1a5   :  { %1030 = vmatprep.subr.bf16.mxu0 %v1029_v57 }
 0x1a8   :  { %1032 = vmatpush3.bf16.msra.mxu0 %v1029_v57 }
 0x1a9   :  { %1034 = vmatprep.subr.bf16.mxu0 %v1033_v60 }
 0x1ac   :  { %1036 = vmatpush3.bf16.msra.mxu0 %v1033_v60 }
 0x1ad   :  { %1038 = vmatprep.subr.bf16.mxu0 %v1037_v52 }
 0x1b0   :  { %1040 = vmatpush3.bf16.msra.mxu0 %v1037_v52 }
 0x1b1   :  { %1042 = vmatprep.subr.bf16.mxu0 %v1041_v1 }
 0x1b4   :  { %1044 = vmatpush3.bf16.msra.mxu0 %v1041_v1 }
 0x1b7   :  { %883 = vmatmul.mubr.f32.vlgmr.msra.gmra.mrb[0].mxu0 %v1429_v8 }
 0x28a   :  { %v884_v3 = vpop.f32.mrb[0].mxu0 }
 0x28b   :  { %v596_v4 = vadd.f32 %v884_v3, %v619_v2  ;;  %v577_v5 = vpop.f32.mrb[1].mxu0 }
 0x28c   :  { %v595_v6 = vadd.f32 %v619_v2, %v577_v5 }
 0x28d   :  { %598 = vst [vmem:[#allocation14 + $0x8] sm:$0xff] %v596_v4 }
 0x28e   :  { %597 = vst [vmem:[#allocation14] sm:$0xff] %v595_v6 }
 0x28f   :  { %1224 = shalt.err (!%p1221_p4)
}
 0x290   :  { %s1225_s7 = scalar_lea.hbm %s1460_s8, 256 }
 0x291   :  { %p1226_p5 = scmp.ne.s32.totalorder %s1460_s8, %s1225_s7  ;;  %p1229_p6 = scmp.lt.u32.totalorder %s1225_s7, %s1460_s8 }
 0x293   :  { %p1231_p7 = pnand %p1229_p6, %p1226_p5 }
 0x295   :  { %1234 = shalt.err (!%p1231_p7)
}
 0x296   :  { %610 = dma.vmem_to_hbm [thread:$0]  %s605_s12, 256, %s1460_s8, [#allocation4], %s1247_s17, %s1247_s17, %s1248_s18  }
 0x297   :  { %1243 = dma.done.wait [#allocation4], 256  }
 0x298   :  { %1244 = vsyncadd [#allocation4], 4294967040 }
 0x299   :  { %614 = vsyncpa [#allocation3], 1 }
 0x29a   :  { %615 = vsyncpa [#allocation6], 1 }
 0x29b   :  { %616 = vsyncpa [#allocation9], 1 }
 0x29c   :  { %617 = vsyncpa [#allocation12], 1 }
 0x29d   :  { %618 = vsyncpa [#allocation4], 1 }

// kernel: tpu_custom_call.1
= control target key start
LH: loop header
LB: loop body
LE: loop exit
PB: predicated region body
PF: predicated region fallthrough
CT: control target
= control target key end

     0   :  { %13 = vsyncpa [#allocation3], 0  ;;  %s1452_s0 = inlined_call_operand.hbm [shape: f32[16,128], index: 0, kind: input, shape index: {}]   ;;  %s1453_s1 = inlined_call_operand.hbm [shape: f32[16,128], index: 1, kind: input, shape index: {}]   ;;  %s1454_s2 = inlined_call_operand.hbm [shape: f32[128,128], index: 2, kind: input, shape index: {}]   ;;  %s1455_s3 = inlined_call_operand.hbm [shape: f32[128,128], index: 3, kind: input, shape index: {}]   ;;  %s1456_s4 = inlined_call_operand.hbm [shape: f32[128,128], index: 4, kind: input, shape index: {}]   ;;  %s1457_s5 = inlined_call_operand.hbm [shape: f32[128,128], index: 5, kind: input, shape index: {}]   ;;  %s1458_s6 = inlined_call_operand.hbm [shape: f32[128,128], index: 6, kind: input, shape index: {}]   ;;  %s1459_s7 = inlined_call_operand.vmem [shape: f32[1,128], index: 7, kind: input, shape index: {}]   ;;  %s1460_s8 = inlined_call_operand.hbm [shape: f32[16,128], index: 8, kind: output, shape index: {}]  }
   0x1   :  { %14 = vsyncpa [#allocation6], 0 }
   0x2   :  { %15 = vsyncpa [#allocation9], 0 }
   0x3   :  { %16 = vsyncpa [#allocation12], 0 }
   0x4   :  { %17 = vsyncpa [#allocation4], 0  ;;  %s1245_s27 = smov [#allocation5]   ;;  %s1246_s29 = smov [#allocation8]  }
   0x5   :  { %s35_s28 = sshll.u32 %s1245_s27, 4  ;;  %s59_s30 = sshll.u32 %s1246_s29, 4  ;;  %s36_s28 = int_to_ptr.vmem [resolvable:$true] %s35_s28  ;;  %s1300_s30 = int_to_ptr.vmem [resolvable:$true] %s59_s30 }
   0x6   :  { %s1059_s11 = scalar_lea.hbm %s1453_s1, 256 }
   0x7   :  { %p1060_p0 = scmp.ne.s32.totalorder %s1453_s1, %s1059_s11  ;;  %p1063_p1 = scmp.lt.u32.totalorder %s1059_s11, %s1453_s1 }
   0x9   :  { %p1065_p2 = pnand %p1063_p1, %p1060_p0 }
   0xb   :  { %1068 = shalt.err (!%p1065_p2)
}
   0xc   :  { %s1069_s16 = scalar_lea.vmem %s36_s28, 256  ;;  %p1074_p4 = scmp.lt.s32.totalorder %s36_s28, %s36_s28 }
   0xd   :  { %p1070_p3 = scmp.ne.s32.totalorder %s36_s28, %s1069_s16  ;;  %p1075_p5 = scmp.lt.s32.totalorder %s1069_s16, %s1069_s16 }
   0xf   :  { %p1076_p6 = por %p1075_p5, %p1074_p4 }
  0x11   :  { %p1077_p7 = pnand %p1076_p6, %p1070_p3 }
  0x13   :  { %1080 = shalt.err (!%p1077_p7)
}
  0x14   :  { %s1247_s17 = smov 128   ;;  %s1248_s18 = smov 8  }
  0x15   :  { %41 = dma.hbm_to_vmem [thread:$0]  %s1453_s1, 256, %s36_s28, [#allocation6], %s1247_s17, %s1247_s17, %s1248_s18  }
  0x16   :  { %s1081_s23 = scalar_lea.hbm %s1455_s3, 2048 }
  0x17   :  { %p1082_p8 = scmp.ne.s32.totalorder %s1455_s3, %s1081_s23  ;;  %p1085_p9 = scmp.lt.u32.totalorder %s1081_s23, %s1455_s3 }
  0x19   :  { %p1087_p10 = pnand %p1085_p9, %p1082_p8 }
  0x1b   :  { %1090 = shalt.err (!%p1087_p10)
}
  0x1c   :  { %s1091_s29 = scalar_lea.vmem %s1300_s30, 2048  ;;  %p1096_p12 = scmp.lt.s32.totalorder %s1300_s30, %s1300_s30 }
  0x1d   :  { %p1092_p11 = scmp.ne.s32.totalorder %s1300_s30, %s1091_s29  ;;  %p1097_p13 = scmp.lt.s32.totalorder %s1091_s29, %s1091_s29 }
  0x1f   :  { %p1098_p0 = por %p1097_p13, %p1096_p12 }
  0x21   :  { %p1099_p1 = pnand %p1098_p0, %p1092_p11 }
  0x23   :  { %1102 = shalt.err (!%p1099_p1)
}
  0x24   :  { %65 = dma.hbm_to_vmem [thread:$0]  %s1455_s3, 2048, %s1300_s30, [#allocation9], %s1247_s17, %s1247_s17, %s1248_s18  }
  0x25   :  { %s1249_s9 = smov [#allocation11]   ;;  %s1250_s11 = smov [#allocation2]  }
  0x26   :  { %s83_s10 = sshll.u32 %s1249_s9, 4  ;;  %s23_s12 = sshll.u32 %s1250_s11, 4  ;;  %s84_s10 = int_to_ptr.vmem [resolvable:$true] %s83_s10  ;;  %s1337_s12 = int_to_ptr.vmem [resolvable:$true] %s23_s12 }
  0x27   :  { %s1103_s15 = scalar_lea.hbm %s1457_s5, 2048 }
  0x28   :  { %p1104_p2 = scmp.ne.s32.totalorder %s1457_s5, %s1103_s15  ;;  %p1107_p3 = scmp.lt.u32.totalorder %s1103_s15, %s1457_s5 }
  0x2a   :  { %p1109_p4 = pnand %p1107_p3, %p1104_p2 }
  0x2c   :  { %1112 = shalt.err (!%p1109_p4)
}
  0x2d   :  { %s1113_s3 = scalar_lea.vmem %s84_s10, 2048  ;;  %p1118_p6 = scmp.lt.s32.totalorder %s84_s10, %s84_s10 }
  0x2e   :  { %p1114_p5 = scmp.ne.s32.totalorder %s84_s10, %s1113_s3  ;;  %p1119_p7 = scmp.lt.s32.totalorder %s1113_s3, %s1113_s3 }
  0x30   :  { %p1120_p8 = por %p1119_p7, %p1118_p6 }
  0x32   :  { %p1121_p9 = pnand %p1120_p8, %p1114_p5 }
  0x34   :  { %1124 = shalt.err (!%p1121_p9)
}
  0x35   :  { %89 = dma.hbm_to_vmem [thread:$0]  %s1457_s5, 2048, %s84_s10, [#allocation12], %s1247_s17, %s1247_s17, %s1248_s18  }
  0x36   :  { %s1125_s25 = scalar_lea.hbm %s1452_s0, 256 }
  0x37   :  { %p1126_p10 = scmp.ne.s32.totalorder %s1452_s0, %s1125_s25  ;;  %p1129_p11 = scmp.lt.u32.totalorder %s1125_s25, %s1452_s0 }
  0x39   :  { %p1131_p12 = pnand %p1129_p11, %p1126_p10 }
  0x3b   :  { %1134 = shalt.err (!%p1131_p12)
}
  0x3c   :  { %s1135_s28 = scalar_lea.vmem %s1337_s12, 256  ;;  %p1140_p0 = scmp.lt.s32.totalorder %s1337_s12, %s1337_s12 }
  0x3d   :  { %p1136_p13 = scmp.ne.s32.totalorder %s1337_s12, %s1135_s28  ;;  %p1141_p1 = scmp.lt.s32.totalorder %s1135_s28, %s1135_s28 }
  0x3f   :  { %p1142_p2 = por %p1141_p1, %p1140_p0 }
  0x41   :  { %p1143_p3 = pnand %p1142_p2, %p1136_p13 }
  0x43   :  { %1146 = shalt.err (!%p1143_p3)
}
  0x44   :  { %29 = dma.hbm_to_vmem [thread:$0]  %s1452_s0, 256, %s1337_s12, [#allocation3], %s1247_s17, %s1247_s17, %s1248_s18  }
  0x45   :  { %s1251_s10 = smov [#allocation7]   ;;  %s1252_s13 = smov [#allocation10]  }
  0x46   :  { %s47_s11 = sshll.u32 %s1251_s10, 4  ;;  %s71_s14 = sshll.u32 %s1252_s13, 4  ;;  %s48_s11 = int_to_ptr.vmem [resolvable:$true] %s47_s11  ;;  %s1374_s14 = int_to_ptr.vmem [resolvable:$true] %s71_s14 }
  0x47   :  { %s1147_s19 = scalar_lea.hbm %s1454_s2, 2048 }
  0x48   :  { %p1148_p4 = scmp.ne.s32.totalorder %s1454_s2, %s1147_s19  ;;  %p1151_p5 = scmp.lt.u32.totalorder %s1147_s19, %s1454_s2 }
  0x4a   :  { %p1153_p6 = pnand %p1151_p5, %p1148_p4 }
  0x4c   :  { %1156 = shalt.err (!%p1153_p6)
}
  0x4d   :  { %s1157_s0 = scalar_lea.vmem %s48_s11, 2048  ;;  %p1162_p8 = scmp.lt.s32.totalorder %s48_s11, %s48_s11 }
  0x4e   :  { %p1158_p7 = scmp.ne.s32.totalorder %s48_s11, %s1157_s0  ;;  %p1163_p9 = scmp.lt.s32.totalorder %s1157_s0, %s1157_s0 }
  0x50   :  { %p1164_p10 = por %p1163_p9, %p1162_p8 }
  0x52   :  { %p1165_p11 = pnand %p1164_p10, %p1158_p7 }
  0x54   :  { %1168 = shalt.err (!%p1165_p11)
}
  0x55   :  { %53 = dma.hbm_to_vmem [thread:$0]  %s1454_s2, 2048, %s48_s11, [#allocation6], %s1247_s17, %s1247_s17, %s1248_s18  }
  0x56   :  { %s1169_s25 = scalar_lea.hbm %s1456_s4, 2048 }
  0x57   :  { %p1170_p12 = scmp.ne.s32.totalorder %s1456_s4, %s1169_s25  ;;  %p1173_p13 = scmp.lt.u32.totalorder %s1169_s25, %s1456_s4 }
  0x59   :  { %p1175_p0 = pnand %p1173_p13, %p1170_p12 }
  0x5b   :  { %1178 = shalt.err (!%p1175_p0)
}
  0x5c   :  { %s1179_s28 = scalar_lea.vmem %s1374_s14, 2048  ;;  %p1184_p2 = scmp.lt.s32.totalorder %s1374_s14, %s1374_s14 }
  0x5d   :  { %p1180_p1 = scmp.ne.s32.totalorder %s1374_s14, %s1179_s28  ;;  %p1185_p3 = scmp.lt.s32.totalorder %s1179_s28, %s1179_s28 }
  0x5f   :  { %p1186_p4 = por %p1185_p3, %p1184_p2 }
  0x61   :  { %p1187_p5 = pnand %p1186_p4, %p1180_p1 }
  0x63   :  { %1190 = shalt.err (!%p1187_p5)
}
  0x64   :  { %77 = dma.hbm_to_vmem [thread:$0]  %s1456_s4, 2048, %s1374_s14, [#allocation9], %s1247_s17, %s1247_s17, %s1248_s18  }
  0x65   :  { %s1253_s9 = smov [#allocation13]   ;;  %s1191_s15 = scalar_lea.hbm %s1458_s6, 2048 }
  0x66   :  { %s95_s10 = sshll.u32 %s1253_s9, 4  ;;  %p1192_p6 = scmp.ne.s32.totalorder %s1458_s6, %s1191_s15  ;;  %s96_s10 = int_to_ptr.vmem [resolvable:$true] %s95_s10 }
  0x67   :  { %p1195_p7 = scmp.lt.u32.totalorder %s1191_s15, %s1458_s6 }
  0x69   :  { %p1197_p8 = pnand %p1195_p7, %p1192_p6 }
  0x6b   :  { %1200 = shalt.err (!%p1197_p8)
}
  0x6c   :  { %s1201_s3 = scalar_lea.vmem %s96_s10, 2048  ;;  %p1206_p10 = scmp.lt.s32.totalorder %s96_s10, %s96_s10 }
  0x6d   :  { %p1202_p9 = scmp.ne.s32.totalorder %s96_s10, %s1201_s3  ;;  %p1207_p11 = scmp.lt.s32.totalorder %s1201_s3, %s1201_s3 }
  0x6f   :  { %p1208_p12 = por %p1207_p11, %p1206_p10 }
  0x71   :  { %p1209_p13 = pnand %p1208_p12, %p1202_p9 }
  0x73   :  { %1212 = shalt.err (!%p1209_p13)
}
  0x74   :  { %101 = dma.hbm_to_vmem [thread:$0]  %s1458_s6, 2048, %s96_s10, [#allocation12], %s1247_s17, %s1247_s17, %s1248_s18  }
  0x75   :  { %1235 = dma.done.wait [#allocation3], 256  }
  0x76   :  { %1236 = vsyncadd [#allocation3], 4294967040 }
  0x77   :  { %1237 = dma.done.wait [#allocation6], 2304  }
  0x78   :  { %1238 = vsyncadd [#allocation6], 4294964992 }
  0x79   :  { %1239 = dma.done.wait [#allocation9], 4096  }
  0x7a   :  { %1240 = vsyncadd [#allocation9], 4294963200 }
  0x7b   :  { %1241 = dma.done.wait [#allocation12], 4096  }
  0x7c   :  { %1242 = vsyncadd [#allocation12], 4294963200  ;;  %v129_v0 = vld [vmem:[#allocation7] sm:$0xff]  ;;  %v130_v1 = vld [vmem:[#allocation7 + $0x8] sm:$0xff]  ;;  %s1254_s0 = smov [#allocation14]  }
  0x7d   :  { %v131_v2 = vld [vmem:[#allocation7 + $0x10] sm:$0xff]  ;;  %v885_v3 = vpack.c.bf16 %v130_v1, %v129_v0  ;;  %v132_v4 = vld [vmem:[#allocation7 + $0x18] sm:$0xff]  ;;  %v133_v6 = vld [vmem:[#allocation7 + $0x20] sm:$0xff]  ;;  %s604_s12 = sshll.u32 %s1254_s0, 4  ;;  %s605_s12 = int_to_ptr.vmem [resolvable:$true] %s604_s12 }
  0x7e   :  { %v889_v5 = vpack.c.bf16 %v132_v4, %v131_v2  ;;  %v134_v7 = vld [vmem:[#allocation7 + $0x28] sm:$0xff]  ;;  %v125_v9 = vld [vmem:[#allocation2] sm:$0xff]  ;;  %v135_v10 = vld [vmem:[#allocation7 + $0x30] sm:$0xff]  ;;  %s1213_s22 = scalar_lea.vmem %s605_s12, 256  ;;  %p1218_p1 = scmp.lt.s32.totalorder %s605_s12, %s605_s12 }
  0x7f   :  { %886 = vmatprep.subr.bf16.mxu1 %v885_v3  ;;  %v893_v8 = vpack.c.bf16 %v134_v7, %v133_v6  ;;  %v136_v11 = vld [vmem:[#allocation7 + $0x38] sm:$0xff]  ;;  %742 = vmatprep.mubr.f32.mxu1 %v125_v9  ;;  %v137_v13 = vld [vmem:[#allocation7 + $0x40] sm:$0xff]  ;;  %v138_v14 = vld [vmem:[#allocation7 + $0x48] sm:$0xff]  ;;  %p1214_p0 = scmp.ne.s32.totalorder %s605_s12, %s1213_s22  ;;  %p1219_p2 = scmp.lt.s32.totalorder %s1213_s22, %s1213_s22 }
  0x80   :  { %888 = vmatpush3.bf16.msra.mxu1 %v885_v3  ;;  %812 = vmatprep.mubr.f32.mxu0 %v125_v9  ;;  %v897_v12 = vpack.c.bf16 %v136_v11, %v135_v10  ;;  %v329_v15 = vld [vmem:[#allocation11] sm:$0xff]  ;;  %v330_v16 = vld [vmem:[#allocation11 + $0x8] sm:$0xff]  ;;  %v331_v17 = vld [vmem:[#allocation11 + $0x10] sm:$0xff]  ;;  %v901_v18 = vpack.c.bf16 %v138_v14, %v137_v13 }
  0x81   :  { %890 = vmatprep.subr.bf16.mxu1 %v889_v5  ;;  %v139_v19 = vld [vmem:[#allocation7 + $0x50] sm:$0xff]  ;;  %v949_v20 = vpack.c.bf16 %v330_v16, %v329_v15  ;;  %v332_v21 = vld [vmem:[#allocation11 + $0x18] sm:$0xff]  ;;  %v333_v24 = vld [vmem:[#allocation11 + $0x20] sm:$0xff]  ;;  %p1220_p3 = por %p1219_p2, %p1218_p1 }
  0x82   :  { %v140_v22 = vld [vmem:[#allocation7 + $0x58] sm:$0xff]  ;;  %v953_v23 = vpack.c.bf16 %v332_v21, %v331_v17  ;;  %v334_v25 = vld [vmem:[#allocation11 + $0x28] sm:$0xff]  ;;  %v141_v27 = vld [vmem:[#allocation7 + $0x60] sm:$0xff] }
  0x83   :  { %950 = vmatprep.subr.bf16.mxu0 %v949_v20  ;;  %v905_v26 = vpack.c.bf16 %v140_v22, %v139_v19  ;;  %v957_v28 = vpack.c.bf16 %v334_v25, %v333_v24  ;;  %v142_v29 = vld [vmem:[#allocation7 + $0x68] sm:$0xff]  ;;  %v335_v30 = vld [vmem:[#allocation11 + $0x30] sm:$0xff]  ;;  %v336_v31 = vld [vmem:[#allocation11 + $0x38] sm:$0xff]  ;;  %p1221_p4 = pnand %p1220_p3, %p1214_p0 }
  0x84   :  { %892 = vmatpush3.bf16.msra.mxu1 %v889_v5  ;;  %952 = vmatpush3.bf16.msra.mxu0 %v949_v20  ;;  %v909_v32 = vpack.c.bf16 %v142_v29, %v141_v27  ;;  %v143_v33 = vld [vmem:[#allocation7 + $0x70] sm:$0xff]  ;;  %v961_v34 = vpack.c.bf16 %v336_v31, %v335_v30  ;;  %v144_v35 = vld [vmem:[#allocation7 + $0x78] sm:$0xff]  ;;  %v337_v36 = vld [vmem:[#allocation11 + $0x40] sm:$0xff] }
  0x85   :  { %894 = vmatprep.subr.bf16.mxu1 %v893_v8  ;;  %954 = vmatprep.subr.bf16.mxu0 %v953_v23  ;;  %v338_v37 = vld [vmem:[#allocation11 + $0x48] sm:$0xff]  ;;  %v913_v38 = vpack.c.bf16 %v144_v35, %v143_v33  ;;  %v220_v39 = vld [vmem:[#allocation8] sm:$0xff]  ;;  %v339_v42 = vld [vmem:[#allocation11 + $0x50] sm:$0xff] }
  0x86   :  { %v965_v40 = vpack.c.bf16 %v338_v37, %v337_v36  ;;  %v221_v41 = vld [vmem:[#allocation8 + $0x8] sm:$0xff]  ;;  %v340_v43 = vld [vmem:[#allocation11 + $0x58] sm:$0xff]  ;;  %v222_v46 = vld [vmem:[#allocation8 + $0x10] sm:$0xff] }
  0x87   :  { %v917_v44 = vpack.c.bf16 %v221_v41, %v220_v39  ;;  %v969_v45 = vpack.c.bf16 %v340_v43, %v339_v42  ;;  %v223_v47 = vld [vmem:[#allocation8 + $0x18] sm:$0xff]  ;;  %v341_v48 = vld [vmem:[#allocation11 + $0x60] sm:$0xff]  ;;  %v342_v49 = vld [vmem:[#allocation11 + $0x68] sm:$0xff] }
  0x88   :  { %896 = vmatpush3.bf16.msra.mxu1 %v893_v8  ;;  %956 = vmatpush3.bf16.msra.mxu0 %v953_v23  ;;  %v126_v50 = vld [vmem:[#allocation2 + $0x8] sm:$0xff]  ;;  %v921_v51 = vpack.c.bf16 %v223_v47, %v222_v46  ;;  %v1426_v52 = vld [vmem:[#allocation5] sm:$0xff]  ;;  %v224_v53 = vld [vmem:[#allocation8 + $0x20] sm:$0xff]  ;;  %v973_v55 = vpack.c.bf16 %v342_v49, %v341_v48 }
  0x89   :  { %898 = vmatprep.subr.bf16.mxu1 %v897_v12  ;;  %958 = vmatprep.subr.bf16.mxu0 %v957_v28  ;;  %v225_v54 = vld [vmem:[#allocation8 + $0x28] sm:$0xff]  ;;  %v226_v57 = vld [vmem:[#allocation8 + $0x30] sm:$0xff]  ;;  %v227_v58 = vld [vmem:[#allocation8 + $0x38] sm:$0xff] }
  0x8a   :  { %v925_v56 = vpack.c.bf16 %v225_v54, %v224_v53  ;;  %v929_v59 = vpack.c.bf16 %v227_v58, %v226_v57  ;;  %v228_v60 = vld [vmem:[#allocation8 + $0x40] sm:$0xff]  ;;  %v229_v61 = vld [vmem:[#allocation8 + $0x48] sm:$0xff]  ;;  %v230_v63 = vld [vmem:[#allocation8 + $0x50] sm:$0xff] }
  0x8b   :  { %v933_v62 = vpack.c.bf16 %v229_v61, %v228_v60  ;;  %v231_v0 = vld [vmem:[#allocation8 + $0x58] sm:$0xff]  ;;  %v232_v2 = vld [vmem:[#allocation8 + $0x60] sm:$0xff]  ;;  %v233_v3 = vld [vmem:[#allocation8 + $0x68] sm:$0xff] }
  0x8c   :  { %900 = vmatpush3.bf16.msra.mxu1 %v897_v12  ;;  %960 = vmatpush3.bf16.msra.mxu0 %v957_v28  ;;  %v937_v1 = vpack.c.bf16 %v231_v0, %v230_v63  ;;  %v941_v4 = vpack.c.bf16 %v233_v3, %v232_v2  ;;  %v234_v5 = vld [vmem:[#allocation8 + $0x70] sm:$0xff]  ;;  %v235_v6 = vld [vmem:[#allocation8 + $0x78] sm:$0xff]  ;;  %v313_v12 = vld [vmem:[#allocation10] sm:$0xff] }
  0x8d   :  { %902 = vmatprep.subr.bf16.mxu1 %v901_v18  ;;  %962 = vmatprep.subr.bf16.mxu0 %v961_v34  ;;  %v945_v7 = vpack.c.bf16 %v235_v6, %v234_v5  ;;  %v1429_v8 = vld [vmem:[#allocation5 + $0x8] sm:$0xff]  ;;  %v343_v9 = vld [vmem:[#allocation11 + $0x70] sm:$0xff]  ;;  %v314_v13 = vld [vmem:[#allocation10 + $0x8] sm:$0xff] }
  0x8e   :  { %v344_v10 = vld [vmem:[#allocation11 + $0x78] sm:$0xff]  ;;  %v315_v14 = vld [vmem:[#allocation10 + $0x10] sm:$0xff]  ;;  %v981_v15 = vpack.c.bf16 %v314_v13, %v313_v12  ;;  %v318_v19 = vld [vmem:[#allocation10 + $0x28] sm:$0xff] }
  0x8f   :  { %v977_v11 = vpack.c.bf16 %v344_v10, %v343_v9  ;;  %v316_v16 = vld [vmem:[#allocation10 + $0x18] sm:$0xff]  ;;  %v319_v21 = vld [vmem:[#allocation10 + $0x30] sm:$0xff]  ;;  %v321_v24 = vld [vmem:[#allocation10 + $0x40] sm:$0xff] }
  0x90   :  { %904 = vmatpush3.bf16.msra.mxu1 %v901_v18  ;;  %964 = vmatpush3.bf16.msra.mxu0 %v961_v34  ;;  %v985_v17 = vpack.c.bf16 %v316_v16, %v315_v14  ;;  %v317_v18 = vld [vmem:[#allocation10 + $0x20] sm:$0xff]  ;;  %v320_v22 = vld [vmem:[#allocation10 + $0x38] sm:$0xff]  ;;  %v322_v25 = vld [vmem:[#allocation10 + $0x48] sm:$0xff] }
  0x91   :  { %906 = vmatprep.subr.bf16.mxu1 %v905_v26  ;;  %966 = vmatprep.subr.bf16.mxu0 %v965_v40  ;;  %v989_v20 = vpack.c.bf16 %v318_v19, %v317_v18  ;;  %v993_v23 = vpack.c.bf16 %v320_v22, %v319_v21  ;;  %v323_v27 = vld [vmem:[#allocation10 + $0x50] sm:$0xff]  ;;  %v324_v28 = vld [vmem:[#allocation10 + $0x58] sm:$0xff]  ;;  %v325_v30 = vld [vmem:[#allocation10 + $0x60] sm:$0xff] }
  0x92   :  { %v1001_v29 = vpack.c.bf16 %v324_v28, %v323_v27  ;;  %v326_v31 = vld [vmem:[#allocation10 + $0x68] sm:$0xff]  ;;  %v327_v33 = vld [vmem:[#allocation10 + $0x70] sm:$0xff]  ;;  %v328_v34 = vld [vmem:[#allocation10 + $0x78] sm:$0xff] }
  0x93   :  { %v1009_v35 = vpack.c.bf16 %v328_v34, %v327_v33  ;;  %v495_v36 = vld [vmem:[#allocation13] sm:$0xff]  ;;  %v496_v37 = vld [vmem:[#allocation13 + $0x8] sm:$0xff]  ;;  %v497_v42 = vld [vmem:[#allocation13 + $0x10] sm:$0xff] }
  0x94   :  { %908 = vmatpush3.bf16.msra.mxu1 %v905_v26  ;;  %968 = vmatpush3.bf16.msra.mxu0 %v965_v40  ;;  %v997_v26 = vpack.c.bf16 %v322_v25, %v321_v24  ;;  %v498_v43 = vld [vmem:[#allocation13 + $0x18] sm:$0xff]  ;;  %v499_v48 = vld [vmem:[#allocation13 + $0x20] sm:$0xff]  ;;  %v500_v49 = vld [vmem:[#allocation13 + $0x28] sm:$0xff] }
  0x95   :  { %910 = vmatprep.subr.bf16.mxu1 %v909_v32  ;;  %970 = vmatprep.subr.bf16.mxu0 %v969_v45  ;;  %v1017_v47 = vpack.c.bf16 %v498_v43, %v497_v42  ;;  %v502_v53 = vld [vmem:[#allocation13 + $0x38] sm:$0xff]  ;;  %v505_v58 = vld [vmem:[#allocation13 + $0x50] sm:$0xff]  ;;  %v507_v61 = vld [vmem:[#allocation13 + $0x60] sm:$0xff] }
  0x96   :  { %v509_v63 = vld [vmem:[#allocation13 + $0x70] sm:$0xff]  ;;  %v510_v0 = vld [vmem:[#allocation13 + $0x78] sm:$0xff]  ;;  %v619_v2 = vld [vmem:[%s1459_s7] ss:$0 sm:$0xff] }
  0x98   :  { %912 = vmatpush3.bf16.msra.mxu1 %v909_v32  ;;  %972 = vmatpush3.bf16.msra.mxu0 %v969_v45  ;;  %v1005_v32 = vpack.c.bf16 %v326_v31, %v325_v30 }
  0x99   :  { %914 = vmatprep.subr.bf16.mxu1 %v913_v38  ;;  %974 = vmatprep.subr.bf16.mxu0 %v973_v55 }
  0x9c   :  { %916 = vmatpush3.bf16.msra.mxu1 %v913_v38  ;;  %976 = vmatpush3.bf16.msra.mxu0 %v973_v55  ;;  %v1013_v38 = vpack.c.bf16 %v496_v37, %v495_v36  ;;  %v503_v55 = vld [vmem:[#allocation13 + $0x40] sm:$0xff] }
  0x9d   :  { %918 = vmatprep.subr.bf16.mxu1 %v917_v44  ;;  %978 = vmatprep.subr.bf16.mxu0 %v977_v11 }
  0x9f   :  { %743 = vmatmul.mubr.f32.vlgmr.msra.gmra.mrb[0].mxu1 %v126_v50 }
  0xa0   :  { %920 = vmatpush3.bf16.msra.mxu1 %v917_v44  ;;  %777 = vmatprep.mubr.f32.mxu1 %v1426_v52 }
  0xa1   :  { %922 = vmatprep.subr.bf16.mxu1 %v921_v51  ;;  %980 = vmatpush3.bf16.msra.mxu0 %v977_v11 }
  0xa2   :  { %982 = vmatprep.subr.bf16.mxu0 %v981_v15 }
  0xa4   :  { %924 = vmatpush3.bf16.msra.mxu1 %v921_v51  ;;  %813 = vmatmul.mubr.f32.vlgmr.msra.gmra.mrb[0].mxu0 %v126_v50  ;;  %v1021_v50 = vpack.c.bf16 %v500_v49, %v499_v48  ;;  %v501_v51 = vld [vmem:[#allocation13 + $0x30] sm:$0xff] }
  0xa5   :  { %926 = vmatprep.subr.bf16.mxu1 %v925_v56  ;;  %984 = vmatpush3.bf16.msra.mxu0 %v981_v15  ;;  %v1025_v54 = vpack.c.bf16 %v502_v53, %v501_v51 }
  0xa6   :  { %986 = vmatprep.subr.bf16.mxu0 %v985_v17 }
  0xa8   :  { %928 = vmatpush3.bf16.msra.mxu1 %v925_v56  ;;  %v504_v56 = vld [vmem:[#allocation13 + $0x48] sm:$0xff] }
  0xa9   :  { %930 = vmatprep.subr.bf16.mxu1 %v929_v59  ;;  %988 = vmatpush3.bf16.msra.mxu0 %v985_v17  ;;  %v1029_v57 = vpack.c.bf16 %v504_v56, %v503_v55 }
  0xaa   :  { %990 = vmatprep.subr.bf16.mxu0 %v989_v20 }
  0xac   :  { %932 = vmatpush3.bf16.msra.mxu1 %v929_v59  ;;  %v506_v59 = vld [vmem:[#allocation13 + $0x58] sm:$0xff] }
  0xad   :  { %934 = vmatprep.subr.bf16.mxu1 %v933_v62  ;;  %992 = vmatpush3.bf16.msra.mxu0 %v989_v20  ;;  %v1033_v60 = vpack.c.bf16 %v506_v59, %v505_v58 }
  0xae   :  { %994 = vmatprep.subr.bf16.mxu0 %v993_v23 }
  0xb0   :  { %936 = vmatpush3.bf16.msra.mxu1 %v933_v62  ;;  %v508_v62 = vld [vmem:[#allocation13 + $0x68] sm:$0xff] }
  0xb1   :  { %938 = vmatprep.subr.bf16.mxu1 %v937_v1  ;;  %996 = vmatpush3.bf16.msra.mxu0 %v993_v23 }
  0xb2   :  { %998 = vmatprep.subr.bf16.mxu0 %v997_v26 }
  0xb4   :  { %940 = vmatpush3.bf16.msra.mxu1 %v937_v1  ;;  %v1041_v1 = vpack.c.bf16 %v510_v0, %v509_v63 }
  0xb5   :  { %942 = vmatprep.subr.bf16.mxu1 %v941_v4  ;;  %1000 = vmatpush3.bf16.msra.mxu0 %v997_v26 }
  0xb6   :  { %1002 = vmatprep.subr.bf16.mxu0 %v1001_v29 }
  0xb8   :  { %944 = vmatpush3.bf16.msra.mxu1 %v941_v4 }
  0xb9   :  { %946 = vmatprep.subr.bf16.mxu1 %v945_v7  ;;  %1004 = vmatpush3.bf16.msra.mxu0 %v1001_v29 }
  0xba   :  { %1006 = vmatprep.subr.bf16.mxu0 %v1005_v32 }
  0xbc   :  { %948 = vmatpush3.bf16.msra.mxu1 %v945_v7 }
  0xbd   :  { %1008 = vmatpush3.bf16.msra.mxu0 %v1005_v32 }
  0xbe   :  { %1010 = vmatprep.subr.bf16.mxu0 %v1009_v35 }
  0xbf   :  { %778 = vmatmul.mubr.f32.vlgmr.msra.gmra.mrb[2].mxu1 %v1429_v8 }
  0xc1   :  { %1012 = vmatpush3.bf16.msra.mxu0 %v1009_v35 }
  0xc2   :  { %1014 = vmatprep.subr.bf16.mxu0 %v1013_v38 }
 0x172   :  { %v744_v39 = vpop.f32.mrb[0].mxu1 }
 0x173   :  { %v211_v40 = vpop.f32.mrb[1].mxu1 }
 0x192   :  { %v779_v41 = vpop.f32.mrb[2].mxu1 }
 0x193   :  { %v312_v44 = vmul.f32 %v779_v41, %v744_v39  ;;  %v302_v45 = vpop.f32.mrb[3].mxu1 }
 0x194   :  { %v311_v46 = vmul.f32 %v302_v45, %v211_v40 }
 0x196   :  { %847 = vmatprep.mubr.f32.mxu0 %v311_v46 }
 0x197   :  { %848 = vmatmul.mubr.f32.vlgmr.msra.gmra.mrb[0].mxu0 %v312_v44 }
 0x198   :  { %1016 = vmatpush3.bf16.msra.mxu0 %v1013_v38  ;;  %882 = vmatprep.mubr.f32.mxu0 %v1426_v52  ;;  %v1037_v52 = vpack.c.bf16 %v508_v62, %v507_v61 }
 0x199   :  { %1018 = vmatprep.subr.bf16.mxu0 %v1017_v47 }
 0x19c   :  { %1020 = vmatpush3.bf16.msra.mxu0 %v1017_v47 }
 0x19d   :  { %1022 = vmatprep.subr.bf16.mxu0 %v1021_v50 }
 0x1a0   :  { %1024 = vmatpush3.bf16.msra.mxu0 %v1021_v50 }
 0x1a1   :  { %1026 = vmatprep.subr.bf16.mxu0 %v1025_v54 }
 0x1a4   :  { %1028 = vmatpush3.bf16.msra.mxu0 %v1025_v54 }
 0x1a5   :  { %1030 = vmatprep.subr.bf16.mxu0 %v1029_v57 }
 0x1a8   :  { %1032 = vmatpush3.bf16.msra.mxu0 %v1029_v57 }
 0x1a9   :  { %1034 = vmatprep.subr.bf16.mxu0 %v1033_v60 }
 0x1ac   :  { %1036 = vmatpush3.bf16.msra.mxu0 %v1033_v60 }
 0x1ad   :  { %1038 = vmatprep.subr.bf16.mxu0 %v1037_v52 }
 0x1b0   :  { %1040 = vmatpush3.bf16.msra.mxu0 %v1037_v52 }
 0x1b1   :  { %1042 = vmatprep.subr.bf16.mxu0 %v1041_v1 }
 0x1b4   :  { %1044 = vmatpush3.bf16.msra.mxu0 %v1041_v1 }
 0x1b7   :  { %883 = vmatmul.mubr.f32.vlgmr.msra.gmra.mrb[0].mxu0 %v1429_v8 }
 0x28a   :  { %v884_v3 = vpop.f32.mrb[0].mxu0 }
 0x28b   :  { %v596_v4 = vadd.f32 %v884_v3, %v619_v2  ;;  %v577_v5 = vpop.f32.mrb[1].mxu0 }
 0x28c   :  { %v595_v6 = vadd.f32 %v619_v2, %v577_v5 }
 0x28d   :  { %598 = vst [vmem:[#allocation14 + $0x8] sm:$0xff] %v596_v4 }
 0x28e   :  { %597 = vst [vmem:[#allocation14] sm:$0xff] %v595_v6 }
 0x28f   :  { %1224 = shalt.err (!%p1221_p4)
}
 0x290   :  { %s1225_s7 = scalar_lea.hbm %s1460_s8, 256 }
 0x291   :  { %p1226_p5 = scmp.ne.s32.totalorder %s1460_s8, %s1225_s7  ;;  %p1229_p6 = scmp.lt.u32.totalorder %s1225_s7, %s1460_s8 }
 0x293   :  { %p1231_p7 = pnand %p1229_p6, %p1226_p5 }
 0x295   :  { %1234 = shalt.err (!%p1231_p7)
}
 0x296   :  { %610 = dma.vmem_to_hbm [thread:$0]  %s605_s12, 256, %s1460_s8, [#allocation4], %s1247_s17, %s1247_s17, %s1248_s18  }
 0x297   :  { %1243 = dma.done.wait [#allocation4], 256  }
 0x298   :  { %1244 = vsyncadd [#allocation4], 4294967040 }
 0x299   :  { %614 = vsyncpa [#allocation3], 1 }
 0x29a   :  { %615 = vsyncpa [#allocation6], 1 }
 0x29b   :  { %616 = vsyncpa [#allocation9], 1 }
 0x29c   :  { %617 = vsyncpa [#allocation12], 1 }
 0x29d   :  { %618 = vsyncpa [#allocation4], 1 }

</bundles_post_ra>
